<compile_context>
chip_gen: v5e
topology: v5e:2x2
jax: 0.10.0
libtpu: 0.0.40
codegen_flags: <defaults>
</compile_context>

<pallas_src>
import jax
import jax.numpy as jnp
from jax.experimental import pallas as pl
from jax.experimental.pallas import tpu as pltpu


# ----------------------------------------------------------------------------
# Parameter construction (glue, plain JAX, runs once at setup time)
# ----------------------------------------------------------------------------
def make_tt_cores(key, size_in, size_out, ranks):
    """TT-matrix cores, core k has shape [r_k, m_k, n_k, r_{k+1}] (He-like init)."""
    d = len(size_in)
    prod_in = 1
    for n in size_in:
        prod_in *= n
    prod_rank = 1
    for r in ranks[1:-1]:
        prod_rank *= r
    s = (2.0 / (prod_in * prod_rank)) ** (1.0 / (2 * d))
    cores = []
    for k in range(d):
        key, sub = jax.random.split(key)
        shape = (ranks[k], size_out[k], size_in[k], ranks[k + 1])
        cores.append(s * jax.random.normal(sub, shape, dtype=jnp.float32))
    return cores


def tt_matrix_to_dense(cores):
    """Contract TT cores into dense W of shape (prod(size_out), prod(size_in))."""
    W = cores[0][0]                                  # [m1, n1, r1]
    for c in cores[1:]:                              # c: [r, m, n, r2]
        W = jnp.einsum("MNr,rmns->MmNns", W, c)
        Mp, m, Np, n, r2 = W.shape
        W = W.reshape(Mp * m, Np * n, r2)
    return W[..., 0]                                 # [prod(m), prod(n)]


def tt_split_factors(cores, split):
    """Contract TT-matrix cores into two small Kronecker factors around rank `split`.

    Returns:
      A : [r_split, prod(m_left),  prod(n_left)]
      Bt: [r_split, prod(n_right), prod(m_right)]
    such that W_dense[(mL,mR),(nL,nR)] = sum_r A[r, mL, nL] * Bt[r, nR, mR],
    with the same row-major mode ordering as tt_matrix_to_dense.
    """
    # left half: cores[0 .. split-1]
    L = cores[0][0]                                  # [m1, n1, r1]
    for c in cores[1:split]:
        L = jnp.einsum("MNr,rmns->MmNns", L, c)
        Mp, m, Np, n, r2 = L.shape
        L = L.reshape(Mp * m, Np * n, r2)
    A = jnp.transpose(L, (2, 0, 1))                  # [r, M_left, N_left]

    # right half: cores[split .. d-1]
    R = cores[split]                                 # [r, m, n, r2]
    for c in cores[split + 1:]:
        R = jnp.einsum("RMNr,rmns->RMmNns", R, c)
        Rr, Mp, m, Np, n, r2 = R.shape
        R = R.reshape(Rr, Mp * m, Np * n, r2)
    Bt = jnp.transpose(R[..., 0], (0, 2, 1))         # [r, N_right, M_right]
    return A, Bt


# ----------------------------------------------------------------------------
# Pallas kernels
# ----------------------------------------------------------------------------
def _tt1_kernel(x_ref, a_ref, bt_ref, b1_ref, o_ref):
    """relu( sum_r A[r] @ (X @ Bt[r]) + bias ) for one batch sample.

    x_ref : [1, N_left, N_right]     (one sample, TT-mode split of the input)
    a_ref : [R, M_left, N_left]      left Kronecker factor (tiny)
    bt_ref: [R, N_right, M_right]    right Kronecker factor (tiny)
    b1_ref: [M_left, M_right]        bias, reshaped to the output mode grid
    o_ref : [1, M_left, M_right]
    """
    xb = x_ref[0]                                    # [N_left, N_right]
    y = b1_ref[...]
    for r in range(a_ref.shape[0]):                  # static, rank <= 3
        p = jnp.dot(xb, bt_ref[r], preferred_element_type=jnp.float32)
        y = y + jnp.dot(a_ref[r], p, preferred_element_type=jnp.float32)
    o_ref[0] = jnp.maximum(y, 0.0)                   # fused ReLU


def tt1_layer_pallas(x, A, Bt, b1):
    """ttl1 + ReLU via in-kernel TT contraction.  x: [B, n1..n5] f32."""
    B = x.shape[0]
    R, M_left, N_left = A.shape
    _, N_right, M_right = Bt.shape
    x3 = x.reshape(B, N_left, N_right)               # free row-major bitcast
    b1_2d = b1.reshape(M_left, M_right)
    out = pl.pallas_call(
        _tt1_kernel,
        out_shape=jax.ShapeDtypeStruct((B, M_left, M_right), jnp.float32),
        grid=(B,),
        in_specs=[
            pl.BlockSpec((1, N_left, N_right), lambda b: (b, 0, 0)),
            pl.BlockSpec((R, M_left, N_left), lambda b: (0, 0, 0)),
            pl.BlockSpec((R, N_right, M_right), lambda b: (0, 0, 0)),
            pl.BlockSpec((M_left, M_right), lambda b: (0, 0)),
        ],
        out_specs=pl.BlockSpec((1, M_left, M_right), lambda b: (b, 0, 0)),
        compiler_params=pltpu.CompilerParams(
            # batch axis is embarrassingly parallel -> megacore on v7x
            dimension_semantics=("parallel",),
        ),
    )(x3, A, Bt, b1_2d)
    return out.reshape(B, M_left * M_right)          # free row-major bitcast


def _tail_kernel(h_ref, w2_ref, b2_ref, w3_ref, b3_ref, wl_ref, bl_ref, o_ref):
    # ttl2 + relu
    h2 = jnp.maximum(
        jnp.dot(h_ref[...], w2_ref[...], preferred_element_type=jnp.float32)
        + b2_ref[...],
        0.0,
    )
    # ttl3 + relu
    h3 = jnp.maximum(
        jnp.dot(h2, w3_ref[...], preferred_element_type=jnp.float32)
        + b3_ref[...],
        0.0,
    )
    # final Linear + LogSoftmax (stable)
    logits = (
        jnp.dot(h3, wl_ref[...], preferred_element_type=jnp.float32) + bl_ref[...]
    )
    m = jnp.max(logits, axis=-1, keepdims=True)
    lse = m + jnp.log(jnp.sum(jnp.exp(logits - m), axis=-1, keepdims=True))
    o_ref[...] = (logits - lse).astype(o_ref.dtype)


def fused_tail_pallas(h, w2, b2, w3, b3, wl, bl):
    """log_softmax(relu(relu(h@w2+b2)@w3+b3)@wl+bl). Everything VMEM-resident."""
    M, K = h.shape
    N2 = w2.shape[1]
    N3 = w3.shape[1]
    NL = wl.shape[1]
    full = lambda shape: pl.BlockSpec(shape, lambda i: tuple(0 for _ in shape))
    return pl.pallas_call(
        _tail_kernel,
        out_shape=jax.ShapeDtypeStruct((M, NL), jnp.float32),
        grid=(1,),
        in_specs=[
            full((M, K)),
            full((K, N2)), full((1, N2)),
            full((N2, N3)), full((1, N3)),
            full((N3, NL)), full((1, NL)),
        ],
        out_specs=full((M, NL)),
        compiler_params=pltpu.CompilerParams(
            dimension_semantics=("arbitrary",),
        ),
    )(h, w2, b2.reshape(1, N2), w3, b3.reshape(1, N3), wl, bl.reshape(1, NL))


# ----------------------------------------------------------------------------
# Full forward
# ----------------------------------------------------------------------------
def basic_tt_forward(x, params):
    # x: [B, 3, 8, 8, 8, 8]
    (A1, Bt1, b1), (w2, b2), (w3, b3), (wl, bl) = params
    h1 = tt1_layer_pallas(x, A1, Bt1, b1)                   # [B, 2048] ttl1+relu
    return fused_tail_pallas(h1, w2, b2, w3, b3, wl, bl)    # [B, 2]


def ref_forward(x, ref_weights):
    """Pure-JAX f32 dense reference (validates the in-kernel TT factorization)."""
    (w1, b1), (w2, b2), (w3, b3), (wl, bl) = ref_weights
    hp = jax.lax.Precision.HIGHEST
    h = x.reshape(x.shape[0], -1)
    h = jnp.maximum(jnp.dot(h, w1, precision=hp) + b1, 0.0)
    h = jnp.maximum(jnp.dot(h, w2, precision=hp) + b2, 0.0)
    h = jnp.maximum(jnp.dot(h, w3, precision=hp) + b3, 0.0)
    logits = jnp.dot(h, wl, precision=hp) + bl
    return jax.nn.log_softmax(logits, axis=1)


if __name__ == "__main__":
    key = jax.random.PRNGKey(0)

    layer_defs = [
        ([3, 8, 8, 8, 8], [8, 4, 4, 4, 4], [1, 3, 2, 2, 2, 1]),  # ttl1
        ([8, 4, 4, 4, 4], [4, 2, 2, 2, 2], [1, 2, 2, 2, 2, 1]),  # ttl2
        ([4, 2, 2, 2, 2], [2, 2, 2, 2, 2], [1, 2, 2, 2, 2, 1]),  # ttl3
    ]

    all_cores = []
    for size_in, size_out, ranks in layer_defs:
        key, sub = jax.random.split(key)
        all_cores.append(make_tt_cores(sub, size_in, size_out, ranks))

    # ttl1: factored form only -- the dense 2048 x 12288 weight is never built
    # for the forward path.  Bias init in torchtt LinearLayerTT is zeros.
    A1, Bt1 = tt_split_factors(all_cores[0], split=2)   # [2,32,24], [2,512,64]
    b1 = jnp.zeros((A1.shape[1] * Bt1.shape[2],), jnp.float32)     # [2048]

    # ttl2 / ttl3: dense weights are tiny (<= 0.5 MiB) -> keep dense, VMEM-resident.
    w2 = tt_matrix_to_dense(all_cores[1]).T              # [2048, 64]
    b2 = jnp.zeros((w2.shape[1],), jnp.float32)
    w3 = tt_matrix_to_dense(all_cores[2]).T              # [64, 32]
    b3 = jnp.zeros((w3.shape[1],), jnp.float32)

    # final nn.Linear(32, 2)
    key, kw, kb = jax.random.split(key, 3)
    wl = jax.random.normal(kw, (32, 2), dtype=jnp.float32) / jnp.sqrt(32.0)
    bl = 0.01 * jax.random.normal(kb, (2,), dtype=jnp.float32)

    params = ((A1, Bt1, b1), (w2, b2), (w3, b3), (wl, bl))

    # input: batch of 2 TT-tensorized "images" [B, 3, 8, 8, 8, 8]
    key, kx = jax.random.split(key)
    x = jax.random.normal(kx, (2, 3, 8, 8, 8, 8), dtype=jnp.float32)

    fwd = jax.jit(basic_tt_forward)
    out = jax.block_until_ready(fwd(x, params))

    # f32 dense reference (builds W1 dense once, only for the correctness check)
    w1_dense = tt_matrix_to_dense(all_cores[0]).T        # [12288, 2048]
    ref_weights = ((w1_dense, b1), (w2, b2), (w3, b3), (wl, bl))
    ref = jax.block_until_ready(ref_forward(x, ref_weights))

    assert out.shape == (2, 2), out.shape
    assert bool(jnp.all(jnp.isfinite(out)))
    assert bool(jnp.allclose(out, ref, rtol=1e-2, atol=1e-2)), (out, ref)
    # log-softmax rows should (approximately) exp-sum to 1
    assert bool(jnp.allclose(jnp.sum(jnp.exp(out), axis=1), 1.0, atol=1e-3))

    print("KERNEL_OK")
</pallas_src>

<mosaic_0001>
module attributes {stable_mosaic.version = 11 : i64} {
  func.func @_tt1_kernel(%arg0: i32, %arg1: memref<1x24x512xf32, #tpu.memory_space<vmem>>, %arg2: memref<2x32x24xf32, #tpu.memory_space<vmem>>, %arg3: memref<2x512x64xf32, #tpu.memory_space<vmem>>, %arg4: memref<32x64xf32, #tpu.memory_space<vmem>>, %arg5: memref<1x32x64xf32, #tpu.memory_space<vmem>>) attributes {dimension_semantics = [#tpu.dimension_semantics<parallel>], iteration_bounds = array<i64: 2>, scalar_prefetch = 0 : i64, scratch_operands = 0 : i64, tpu.core_type = #tpu.core_type<tc>, window_params = [{transform_indices = @transform_0, window_bounds = array<i64: 1, 24, 512>}, {pipeline_mode = #tpu.pipeline_mode<synchronous>, transform_indices = @transform_1, window_bounds = array<i64: 2, 32, 24>}, {pipeline_mode = #tpu.pipeline_mode<synchronous>, transform_indices = @transform_2, window_bounds = array<i64: 2, 512, 64>}, {pipeline_mode = #tpu.pipeline_mode<synchronous>, transform_indices = @transform_3, window_bounds = array<i64: 32, 64>}, {transform_indices = @transform_4, window_bounds = array<i64: 1, 32, 64>}]} {
    %c0 = arith.constant 0 : index
    %c0_0 = arith.constant 0 : index
    %c0_1 = arith.constant 0 : index
    %0 = vector.load %arg1[%c0, %c0_0, %c0_1] : memref<1x24x512xf32, #tpu.memory_space<vmem>>, vector<1x24x512xf32>
    %1 = vector.shape_cast %0 : vector<1x24x512xf32> to vector<24x512xf32>
    %c0_2 = arith.constant 0 : index
    %c0_3 = arith.constant 0 : index
    %2 = vector.load %arg4[%c0_2, %c0_3] : memref<32x64xf32, #tpu.memory_space<vmem>>, vector<32x64xf32>
    %c0_4 = arith.constant 0 : index
    %c0_5 = arith.constant 0 : index
    %c0_6 = arith.constant 0 : index
    %3 = vector.load %arg3[%c0_4, %c0_5, %c0_6] : memref<2x512x64xf32, #tpu.memory_space<vmem>>, vector<1x512x64xf32>
    %4 = vector.shape_cast %3 : vector<1x512x64xf32> to vector<512x64xf32>
    %cst = arith.constant dense<0.000000e+00> : vector<24x64xf32>
    %5 = tpu.matmul %1, %4, %cst {dimension_numbers = #tpu.dot_dimension_numbers<[1], [0], [0], [1], [0, 0, 1, 1], [], []>} : vector<24x512xf32>, vector<512x64xf32>, vector<24x64xf32> -> vector<24x64xf32>
    %c0_7 = arith.constant 0 : index
    %c0_8 = arith.constant 0 : index
    %c0_9 = arith.constant 0 : index
    %6 = vector.load %arg2[%c0_7, %c0_8, %c0_9] : memref<2x32x24xf32, #tpu.memory_space<vmem>>, vector<1x32x24xf32>
    %7 = vector.shape_cast %6 : vector<1x32x24xf32> to vector<32x24xf32>
    %cst_10 = arith.constant dense<0.000000e+00> : vector<32x64xf32>
    %8 = tpu.matmul %7, %5, %cst_10 {dimension_numbers = #tpu.dot_dimension_numbers<[1], [0], [0], [1], [0, 0, 1, 1], [], []>} : vector<32x24xf32>, vector<24x64xf32>, vector<32x64xf32> -> vector<32x64xf32>
    %9 = arith.addf %2, %8 : vector<32x64xf32>
    %c1 = arith.constant 1 : index
    %c0_11 = arith.constant 0 : index
    %c0_12 = arith.constant 0 : index
    %10 = vector.load %arg3[%c1, %c0_11, %c0_12] : memref<2x512x64xf32, #tpu.memory_space<vmem>>, vector<1x512x64xf32>
    %11 = vector.shape_cast %10 : vector<1x512x64xf32> to vector<512x64xf32>
    %cst_13 = arith.constant dense<0.000000e+00> : vector<24x64xf32>
    %12 = tpu.matmul %1, %11, %cst_13 {dimension_numbers = #tpu.dot_dimension_numbers<[1], [0], [0], [1], [0, 0, 1, 1], [], []>} : vector<24x512xf32>, vector<512x64xf32>, vector<24x64xf32> -> vector<24x64xf32>
    %c1_14 = arith.constant 1 : index
    %c0_15 = arith.constant 0 : index
    %c0_16 = arith.constant 0 : index
    %13 = vector.load %arg2[%c1_14, %c0_15, %c0_16] : memref<2x32x24xf32, #tpu.memory_space<vmem>>, vector<1x32x24xf32>
    %14 = vector.shape_cast %13 : vector<1x32x24xf32> to vector<32x24xf32>
    %cst_17 = arith.constant dense<0.000000e+00> : vector<32x64xf32>
    %15 = tpu.matmul %14, %12, %cst_17 {dimension_numbers = #tpu.dot_dimension_numbers<[1], [0], [0], [1], [0, 0, 1, 1], [], []>} : vector<32x24xf32>, vector<24x64xf32>, vector<32x64xf32> -> vector<32x64xf32>
    %16 = arith.addf %9, %15 : vector<32x64xf32>
    %cst_18 = arith.constant 0.000000e+00 : f32
    %17 = vector.broadcast %cst_18 : f32 to vector<32x64xf32>
    %18 = arith.maximumf %16, %17 : vector<32x64xf32>
    %c0_19 = arith.constant 0 : index
    %c0_20 = arith.constant 0 : index
    %c0_21 = arith.constant 0 : index
    %19 = vector.load %arg5[%c0_19, %c0_20, %c0_21] : memref<1x32x64xf32, #tpu.memory_space<vmem>>, vector<1x32x64xf32>
    %20 = vector.shape_cast %19 : vector<1x32x64xf32> to vector<32x64xf32>
    %21 = vector.shape_cast %18 : vector<32x64xf32> to vector<1x32x64xf32>
    tpu.vector_store %arg5[%c0_19, %c0_20, %c0_21], %21 {strides = array<i32>} : memref<1x32x64xf32, #tpu.memory_space<vmem>>, vector<1x32x64xf32>,
    return
  }
  func.func @transform_0(%arg0: i32) -> (i32, i32, i32) {
    %c0_i32 = arith.constant 0 : i32
    %c0_i32_0 = arith.constant 0 : i32
    %c0_i32_1 = arith.constant 0 : i32
    return %arg0, %c0_i32, %c0_i32_0 : i32, i32, i32
  }
  func.func @transform_1(%arg0: i32) -> (i32, i32, i32) {
    %c0_i32 = arith.constant 0 : i32
    %c0_i32_0 = arith.constant 0 : i32
    %c0_i32_1 = arith.constant 0 : i32
    %c0_i32_2 = arith.constant 0 : i32
    return %c0_i32, %c0_i32_0, %c0_i32_1 : i32, i32, i32
  }
  func.func @transform_2(%arg0: i32) -> (i32, i32, i32) {
    %c0_i32 = arith.constant 0 : i32
    %c0_i32_0 = arith.constant 0 : i32
    %c0_i32_1 = arith.constant 0 : i32
    %c0_i32_2 = arith.constant 0 : i32
    return %c0_i32, %c0_i32_0, %c0_i32_1 : i32, i32, i32
  }
  func.func @transform_3(%arg0: i32) -> (i32, i32) {
    %c0_i32 = arith.constant 0 : i32
    %c0_i32_0 = arith.constant 0 : i32
    %c0_i32_1 = arith.constant 0 : i32
    return %c0_i32, %c0_i32_0 : i32, i32
  }
  func.func @transform_4(%arg0: i32) -> (i32, i32, i32) {
    %c0_i32 = arith.constant 0 : i32
    %c0_i32_0 = arith.constant 0 : i32
    %c0_i32_1 = arith.constant 0 : i32
    return %arg0, %c0_i32, %c0_i32_0 : i32, i32, i32
  }
}

module attributes {stable_mosaic.version = 11 : i64} {
  func.func @_tail_kernel(%arg0: i32, %arg1: memref<2x2048xf32, #tpu.memory_space<vmem>>, %arg2: memref<2048x64xf32, #tpu.memory_space<vmem>>, %arg3: memref<1x64xf32, #tpu.memory_space<vmem>>, %arg4: memref<64x32xf32, #tpu.memory_space<vmem>>, %arg5: memref<1x32xf32, #tpu.memory_space<vmem>>, %arg6: memref<32x2xf32, #tpu.memory_space<vmem>>, %arg7: memref<1x2xf32, #tpu.memory_space<vmem>>, %arg8: memref<2x2xf32, #tpu.memory_space<vmem>>) attributes {dimension_semantics = [#tpu.dimension_semantics<arbitrary>], iteration_bounds = array<i64: 1>, scalar_prefetch = 0 : i64, scratch_operands = 0 : i64, tpu.core_type = #tpu.core_type<tc>, window_params = [{pipeline_mode = #tpu.pipeline_mode<synchronous>, transform_indices = @transform_0, window_bounds = array<i64: 2, 2048>}, {pipeline_mode = #tpu.pipeline_mode<synchronous>, transform_indices = @transform_1, window_bounds = array<i64: 2048, 64>}, {pipeline_mode = #tpu.pipeline_mode<synchronous>, transform_indices = @transform_2, window_bounds = array<i64: 1, 64>}, {pipeline_mode = #tpu.pipeline_mode<synchronous>, transform_indices = @transform_3, window_bounds = array<i64: 64, 32>}, {pipeline_mode = #tpu.pipeline_mode<synchronous>, transform_indices = @transform_4, window_bounds = array<i64: 1, 32>}, {pipeline_mode = #tpu.pipeline_mode<synchronous>, transform_indices = @transform_5, window_bounds = array<i64: 32, 2>}, {pipeline_mode = #tpu.pipeline_mode<synchronous>, transform_indices = @transform_6, window_bounds = array<i64: 1, 2>}, {pipeline_mode = #tpu.pipeline_mode<synchronous>, transform_indices = @transform_7, window_bounds = array<i64: 2, 2>}]} {
    %c0 = arith.constant 0 : index
    %c0_0 = arith.constant 0 : index
    %0 = vector.load %arg1[%c0, %c0_0] : memref<2x2048xf32, #tpu.memory_space<vmem>>, vector<2x2048xf32>
    %c0_1 = arith.constant 0 : index
    %c0_2 = arith.constant 0 : index
    %1 = vector.load %arg2[%c0_1, %c0_2] : memref<2048x64xf32, #tpu.memory_space<vmem>>, vector<2048x64xf32>
    %cst = arith.constant dense<0.000000e+00> : vector<2x64xf32>
    %2 = tpu.matmul %0, %1, %cst {dimension_numbers = #tpu.dot_dimension_numbers<[1], [0], [0], [1], [0, 0, 1, 1], [], []>} : vector<2x2048xf32>, vector<2048x64xf32>, vector<2x64xf32> -> vector<2x64xf32>
    %c0_3 = arith.constant 0 : index
    %c0_4 = arith.constant 0 : index
    %3 = vector.load %arg3[%c0_3, %c0_4] : memref<1x64xf32, #tpu.memory_space<vmem>>, vector<1x64xf32>
    %4 = vector.broadcast %3 : vector<1x64xf32> to vector<2x64xf32>
    %5 = arith.addf %2, %4 : vector<2x64xf32>
    %cst_5 = arith.constant 0.000000e+00 : f32
    %6 = vector.broadcast %cst_5 : f32 to vector<2x64xf32>
    %7 = arith.maximumf %5, %6 : vector<2x64xf32>
    %c0_6 = arith.constant 0 : index
    %c0_7 = arith.constant 0 : index
    %8 = vector.load %arg4[%c0_6, %c0_7] : memref<64x32xf32, #tpu.memory_space<vmem>>, vector<64x32xf32>
    %cst_8 = arith.constant dense<0.000000e+00> : vector<2x32xf32>
    %9 = tpu.matmul %7, %8, %cst_8 {dimension_numbers = #tpu.dot_dimension_numbers<[1], [0], [0], [1], [0, 0, 1, 1], [], []>} : vector<2x64xf32>, vector<64x32xf32>, vector<2x32xf32> -> vector<2x32xf32>
    %c0_9 = arith.constant 0 : index
    %c0_10 = arith.constant 0 : index
    %10 = vector.load %arg5[%c0_9, %c0_10] : memref<1x32xf32, #tpu.memory_space<vmem>>, vector<1x32xf32>
    %11 = vector.broadcast %10 : vector<1x32xf32> to vector<2x32xf32>
    %12 = arith.addf %9, %11 : vector<2x32xf32>
    %cst_11 = arith.constant 0.000000e+00 : f32
    %13 = vector.broadcast %cst_11 : f32 to vector<2x32xf32>
    %14 = arith.maximumf %12, %13 : vector<2x32xf32>
    %c0_12 = arith.constant 0 : index
    %c0_13 = arith.constant 0 : index
    %15 = vector.load %arg6[%c0_12, %c0_13] : memref<32x2xf32, #tpu.memory_space<vmem>>, vector<32x2xf32>
    %cst_14 = arith.constant dense<0.000000e+00> : vector<2x2xf32>
    %16 = tpu.matmul %14, %15, %cst_14 {dimension_numbers = #tpu.dot_dimension_numbers<[1], [0], [0], [1], [0, 0, 1, 1], [], []>} : vector<2x32xf32>, vector<32x2xf32>, vector<2x2xf32> -> vector<2x2xf32>
    %c0_15 = arith.constant 0 : index
    %c0_16 = arith.constant 0 : index
    %17 = vector.load %arg7[%c0_15, %c0_16] : memref<1x2xf32, #tpu.memory_space<vmem>>, vector<1x2xf32>
    %18 = vector.broadcast %17 : vector<1x2xf32> to vector<2x2xf32>
    %19 = arith.addf %16, %18 : vector<2x2xf32>
    %cst_17 = arith.constant dense<0xFF800000> : vector<2xf32>
    %20 = vector.multi_reduction <maximumf>, %19, %cst_17 [1] : vector<2x2xf32> to vector<2xf32>
    %21 = vector.shape_cast %20 : vector<2xf32> to vector<2x1xf32>
    %22 = vector.broadcast %21 : vector<2x1xf32> to vector<2x2xf32>
    %23 = arith.subf %19, %22 : vector<2x2xf32>
    %24 = math.exp %23 : vector<2x2xf32>
    %cst_18 = arith.constant dense<0.000000e+00> : vector<2xf32>
    %25 = vector.multi_reduction <add>, %24, %cst_18 [1] : vector<2x2xf32> to vector<2xf32>
    %26 = vector.shape_cast %25 : vector<2xf32> to vector<2x1xf32>
    %27 = math.log %26 : vector<2x1xf32>
    %28 = arith.addf %21, %27 : vector<2x1xf32>
    %29 = vector.broadcast %28 : vector<2x1xf32> to vector<2x2xf32>
    %30 = arith.subf %19, %29 : vector<2x2xf32>
    %c0_19 = arith.constant 0 : index
    %c0_20 = arith.constant 0 : index
    %31 = vector.load %arg8[%c0_19, %c0_20] : memref<2x2xf32, #tpu.memory_space<vmem>>, vector<2x2xf32>
    tpu.vector_store %arg8[%c0_19, %c0_20], %30 {strides = array<i32>} : memref<2x2xf32, #tpu.memory_space<vmem>>, vector<2x2xf32>,
    return
  }
  func.func @transform_0(%arg0: i32) -> (i32, i32) {
    %c0_i32 = arith.constant 0 : i32
    %c0_i32_0 = arith.constant 0 : i32
    %c0_i32_1 = arith.constant 0 : i32
    return %c0_i32, %c0_i32_0 : i32, i32
  }
  func.func @transform_1(%arg0: i32) -> (i32, i32) {
    %c0_i32 = arith.constant 0 : i32
    %c0_i32_0 = arith.constant 0 : i32
    %c0_i32_1 = arith.constant 0 : i32
    return %c0_i32, %c0_i32_0 : i32, i32
  }
  func.func @transform_2(%arg0: i32) -> (i32, i32) {
    %c0_i32 = arith.constant 0 : i32
    %c0_i32_0 = arith.constant 0 : i32
    %c0_i32_1 = arith.constant 0 : i32
    return %c0_i32, %c0_i32_0 : i32, i32
  }
  func.func @transform_3(%arg0: i32) -> (i32, i32) {
    %c0_i32 = arith.constant 0 : i32
    %c0_i32_0 = arith.constant 0 : i32
    %c0_i32_1 = arith.constant 0 : i32
    return %c0_i32, %c0_i32_0 : i32, i32
  }
  func.func @transform_4(%arg0: i32) -> (i32, i32) {
    %c0_i32 = arith.constant 0 : i32
    %c0_i32_0 = arith.constant 0 : i32
    %c0_i32_1 = arith.constant 0 : i32
    return %c0_i32, %c0_i32_0 : i32, i32
  }
  func.func @transform_5(%arg0: i32) -> (i32, i32) {
    %c0_i32 = arith.constant 0 : i32
    %c0_i32_0 = arith.constant 0 : i32
    %c0_i32_1 = arith.constant 0 : i32
    return %c0_i32, %c0_i32_0 : i32, i32
  }
  func.func @transform_6(%arg0: i32) -> (i32, i32) {
    %c0_i32 = arith.constant 0 : i32
    %c0_i32_0 = arith.constant 0 : i32
    %c0_i32_1 = arith.constant 0 : i32
    return %c0_i32, %c0_i32_0 : i32, i32
  }
  func.func @transform_7(%arg0: i32) -> (i32, i32) {
    %c0_i32 = arith.constant 0 : i32
    %c0_i32_0 = arith.constant 0 : i32
    %c0_i32_1 = arith.constant 0 : i32
    return %c0_i32, %c0_i32_0 : i32, i32
  }
}

</mosaic_0001>

<bundles_post_ra>
// kernel: basic_tt_forward.2
= control target key start
LH: loop header
LB: loop body
LE: loop exit
PB: predicated region body
PF: predicated region fallthrough
CT: control target
= control target key end

     0   :  { %s863_s15 = smov 0   ;;  %s1416_s0 = inlined_call_operand.vmem [shape: f32[2,24,512], index: 0, kind: input, shape index: {}]   ;;  %s1417_s1 = inlined_call_operand.vmem [shape: f32[2,32,24], index: 1, kind: input, shape index: {}]   ;;  %s1418_s2 = inlined_call_operand.vmem [shape: f32[2,512,64], index: 2, kind: input, shape index: {}]   ;;  %s1419_s3 = inlined_call_operand.vmem [shape: f32[32,64], index: 3, kind: input, shape index: {}]   ;;  %s1420_s4 = inlined_call_operand.vmem [shape: f32[2,32,64], index: 4, kind: output, shape index: {}]  }
   0x1 LB: > { %s715_s16 = sadd.s32 4294967295, %s836_s15   ;;  %p719_p0 = scmp.ge.s32.totalorder %s836_s15, 1  ;;  %s836_s15 = sphi %s863_s15, %s14_s15  }
   0x2   : > { %p162_p1 = scmp.lt.s32.totalorder %s836_s15, 3 }
   0x4   : > { %p163_p2 = pnand %p719_p0, %p162_p1 }
   0x5   : > { %p975_p3 = scmp.lt.s32.totalorder (!%p163_p2), %s715_s16, 1 }
   0x6   : > { %166 = sbr.rel (%p163_p2) target bundleno = 517 (0x205), region = 36 }
   0xb   : > { %v261_v0 = vld [vmem:[%s1418_s2 + $0x178] sm:$0xff]  ;;  %v260_v1 = vld [vmem:[%s1418_s2 + $0x170] sm:$0xff]  ;;  %v259_v5 = vld [vmem:[%s1418_s2 + $0x168] sm:$0xff]  ;;  %s1423_s16 = smov (!%p975_p3, %s715_s16), 1  ;;  %vm386_vm0 = vcmask 195584   ;;  %vm655_vm1 = vcmask 523264  }
   0xc   : > { %v277_v2 = vld [vmem:[%s1418_s2 + $0x1f8] sm:$0xff]  ;;  %330 = vmatpush.msra.mxu2 %v261_v0  ;;  %v276_v6 = vld [vmem:[%s1418_s2 + $0x1f0] sm:$0xff]  ;;  %v275_v9 = vld [vmem:[%s1418_s2 + $0x1e8] sm:$0xff]  ;;  %s821_s22 = smul.u32 96, %s1423_s16  ;;  %s801_s6 = sshll.u32 %s1423_s16, 5 }
   0xd   : > { %356 = vmatpush.msra.mxu3 %v277_v2  ;;  %v229_v3 = vld [vmem:[%s1418_s2 + $0x78] sm:$0xff]  ;;  %v228_v7 = vld [vmem:[%s1418_s2 + $0x70] sm:$0xff]  ;;  %v227_v10 = vld [vmem:[%s1418_s2 + $0x68] sm:$0xff]  ;;  %s197_s11 = scalar_lea.vmem %s1420_s4, %s801_s6 }
   0xe   : > { %v245_v4 = vld [vmem:[%s1418_s2 + $0xf8] sm:$0xff]  ;;  %278 = vmatpush.msra.mxu0 %v229_v3  ;;  %v244_v8 = vld [vmem:[%s1418_s2 + $0xf0] sm:$0xff]  ;;  %331 = vmatpush.msra.mxu2 %v260_v1  ;;  %v258_v11 = vld [vmem:[%s1418_s2 + $0x160] sm:$0xff]  ;;  %s1061_s17 = scalar_lea.vmem %s1416_s0, %s821_s22 }
   0xf   : > { %304 = vmatpush.msra.mxu1 %v245_v4  ;;  %357 = vmatpush.msra.mxu3 %v276_v6  ;;  %v243_v12 = vld [vmem:[%s1418_s2 + $0xe8] sm:$0xff]  ;;  %v274_v13 = vld [vmem:[%s1418_s2 + $0x1e0] sm:$0xff]  ;;  %v257_v16 = vld [vmem:[%s1418_s2 + $0x158] sm:$0xff] }
  0x10   : > { %279 = vmatpush.msra.mxu0 %v228_v7  ;;  %332 = vmatpush.msra.mxu2 %v259_v5  ;;  %v226_v14 = vld [vmem:[%s1418_s2 + $0x60] sm:$0xff]  ;;  %v273_v17 = vld [vmem:[%s1418_s2 + $0x1d8] sm:$0xff]  ;;  %v256_v20 = vld [vmem:[%s1418_s2 + $0x150] sm:$0xff] }
  0x11   : > { %305 = vmatpush.msra.mxu1 %v244_v8  ;;  %358 = vmatpush.msra.mxu3 %v275_v9  ;;  %v242_v15 = vld [vmem:[%s1418_s2 + $0xe0] sm:$0xff]  ;;  %v225_v18 = vld [vmem:[%s1418_s2 + $0x58] sm:$0xff]  ;;  %v272_v21 = vld [vmem:[%s1418_s2 + $0x1d0] sm:$0xff] }
  0x12   : > { %280 = vmatpush.msra.mxu0 %v227_v10  ;;  %333 = vmatpush.msra.mxu2 %v258_v11  ;;  %v241_v19 = vld [vmem:[%s1418_s2 + $0xd8] sm:$0xff]  ;;  %v224_v22 = vld [vmem:[%s1418_s2 + $0x50] sm:$0xff]  ;;  %v255_v24 = vld [vmem:[%s1418_s2 + $0x148] sm:$0xff] }
  0x13   : > { %306 = vmatpush.msra.mxu1 %v243_v12  ;;  %359 = vmatpush.msra.mxu3 %v274_v13  ;;  %v240_v23 = vld [vmem:[%s1418_s2 + $0xd0] sm:$0xff]  ;;  %v271_v25 = vld [vmem:[%s1418_s2 + $0x1c8] sm:$0xff]  ;;  %v254_v28 = vld [vmem:[%s1418_s2 + $0x140] sm:$0xff] }
  0x14   : > { %281 = vmatpush.msra.mxu0 %v226_v14  ;;  %334 = vmatpush.msra.mxu2 %v257_v16  ;;  %v223_v26 = vld [vmem:[%s1418_s2 + $0x48] sm:$0xff]  ;;  %v270_v29 = vld [vmem:[%s1418_s2 + $0x1c0] sm:$0xff]  ;;  %v253_v32 = vld [vmem:[%s1418_s2 + $0x138] sm:$0xff] }
  0x15   : > { %307 = vmatpush.msra.mxu1 %v242_v15  ;;  %360 = vmatpush.msra.mxu3 %v273_v17  ;;  %v239_v27 = vld [vmem:[%s1418_s2 + $0xc8] sm:$0xff]  ;;  %v222_v30 = vld [vmem:[%s1418_s2 + $0x40] sm:$0xff]  ;;  %v269_v33 = vld [vmem:[%s1418_s2 + $0x1b8] sm:$0xff] }
  0x16   : > { %282 = vmatpush.msra.mxu0 %v225_v18  ;;  %335 = vmatpush.msra.mxu2 %v256_v20  ;;  %v238_v31 = vld [vmem:[%s1418_s2 + $0xc0] sm:$0xff]  ;;  %v221_v34 = vld [vmem:[%s1418_s2 + $0x38] sm:$0xff]  ;;  %v252_v36 = vld [vmem:[%s1418_s2 + $0x130] sm:$0xff] }
  0x17   : > { %308 = vmatpush.msra.mxu1 %v241_v19  ;;  %361 = vmatpush.msra.mxu3 %v272_v21  ;;  %v237_v35 = vld [vmem:[%s1418_s2 + $0xb8] sm:$0xff]  ;;  %v268_v37 = vld [vmem:[%s1418_s2 + $0x1b0] sm:$0xff]  ;;  %v251_v40 = vld [vmem:[%s1418_s2 + $0x128] sm:$0xff] }
  0x18   : > { %283 = vmatpush.msra.mxu0 %v224_v22  ;;  %336 = vmatpush.msra.mxu2 %v255_v24  ;;  %v220_v38 = vld [vmem:[%s1418_s2 + $0x30] sm:$0xff]  ;;  %v267_v41 = vld [vmem:[%s1418_s2 + $0x1a8] sm:$0xff]  ;;  %v250_v44 = vld [vmem:[%s1418_s2 + $0x120] sm:$0xff] }
  0x19   : > { %309 = vmatpush.msra.mxu1 %v240_v23  ;;  %362 = vmatpush.msra.mxu3 %v271_v25  ;;  %v236_v39 = vld [vmem:[%s1418_s2 + $0xb0] sm:$0xff]  ;;  %v219_v42 = vld [vmem:[%s1418_s2 + $0x28] sm:$0xff]  ;;  %v266_v45 = vld [vmem:[%s1418_s2 + $0x1a0] sm:$0xff] }
  0x1a   : > { %284 = vmatpush.msra.mxu0 %v223_v26  ;;  %337 = vmatpush.msra.mxu2 %v254_v28  ;;  %v235_v43 = vld [vmem:[%s1418_s2 + $0xa8] sm:$0xff]  ;;  %v218_v46 = vld [vmem:[%s1418_s2 + $0x20] sm:$0xff]  ;;  %v249_v48 = vld [vmem:[%s1418_s2 + $0x118] sm:$0xff] }
  0x1b   : > { %310 = vmatpush.msra.mxu1 %v239_v27  ;;  %363 = vmatpush.msra.mxu3 %v270_v29  ;;  %v234_v47 = vld [vmem:[%s1418_s2 + $0xa0] sm:$0xff]  ;;  %v265_v49 = vld [vmem:[%s1418_s2 + $0x198] sm:$0xff]  ;;  %v248_v52 = vld [vmem:[%s1418_s2 + $0x110] sm:$0xff] }
  0x1c   : > { %285 = vmatpush.msra.mxu0 %v222_v30  ;;  %338 = vmatpush.msra.mxu2 %v253_v32  ;;  %v217_v50 = vld [vmem:[%s1418_s2 + $0x18] sm:$0xff]  ;;  %v264_v53 = vld [vmem:[%s1418_s2 + $0x190] sm:$0xff]  ;;  %v247_v56 = vld [vmem:[%s1418_s2 + $0x108] sm:$0xff] }
  0x1d   : > { %311 = vmatpush.msra.mxu1 %v238_v31  ;;  %364 = vmatpush.msra.mxu3 %v269_v33  ;;  %v233_v51 = vld [vmem:[%s1418_s2 + $0x98] sm:$0xff]  ;;  %v216_v54 = vld [vmem:[%s1418_s2 + $0x10] sm:$0xff]  ;;  %v263_v57 = vld [vmem:[%s1418_s2 + $0x188] sm:$0xff] }
  0x1e   : > { %286 = vmatpush.msra.mxu0 %v221_v34  ;;  %339 = vmatpush.msra.mxu2 %v252_v36  ;;  %v232_v55 = vld [vmem:[%s1418_s2 + $0x90] sm:$0xff]  ;;  %v215_v58 = vld [vmem:[%s1418_s2 + $0x8] sm:$0xff]  ;;  %v246_v60 = vld [vmem:[%s1418_s2 + $0x100] sm:$0xff] }
  0x1f   : > { %312 = vmatpush.msra.mxu1 %v237_v35  ;;  %365 = vmatpush.msra.mxu3 %v268_v37  ;;  %v231_v59 = vld [vmem:[%s1418_s2 + $0x88] sm:$0xff]  ;;  %v262_v61 = vld [vmem:[%s1418_s2 + $0x180] sm:$0xff]  ;;  %v1076_v62 = vld [vmem:[%s1061_s17 + $0x10] sm:$0xff] }
  0x20   : > { %287 = vmatpush.msra.mxu0 %v220_v38  ;;  %340 = vmatpush.msra.mxu2 %v251_v40  ;;  %v1079_v63 = vld [vmem:[%s1061_s17 + $0x18] sm:$0xff]  ;;  %v214_v0 = vld [vmem:[%s1418_s2] sm:$0xff]  ;;  %v1091_v3 = vld [vmem:[%s1061_s17 + $0x8] sm:$0xff] }
  0x21   : > { %313 = vmatpush.msra.mxu1 %v236_v39  ;;  %366 = vmatpush.msra.mxu3 %v267_v41  ;;  %v230_v1 = vld [vmem:[%s1418_s2 + $0x80] sm:$0xff]  ;;  %v774_v4 = vld [vmem:[%s1418_s2 + $0x378] sm:$0xff]  ;;  %v773_v5 = vld [vmem:[%s1418_s2 + $0x370] sm:$0xff] }
  0x22   : > { %288 = vmatpush.msra.mxu0 %v219_v42  ;;  %341 = vmatpush.msra.mxu2 %v250_v44  ;;  %v1088_v2 = vld [vmem:[%s1061_s17] sm:$0xff]  ;;  %v772_v6 = vld [vmem:[%s1418_s2 + $0x368] sm:$0xff]  ;;  %v1107_v7 = vld [vmem:[%s1061_s17 + $0x30] sm:$0xff] }
  0x23   : > { %314 = vmatpush.msra.mxu1 %v235_v43  ;;  %367 = vmatpush.msra.mxu3 %v266_v45  ;;  %v1110_v8 = vld [vmem:[%s1061_s17 + $0x38] sm:$0xff]  ;;  %v771_v9 = vld [vmem:[%s1418_s2 + $0x360] sm:$0xff]  ;;  %v1119_v11 = vld [vmem:[%s1061_s17 + $0x28] sm:$0xff] }
  0x24   : > { %289 = vmatpush.msra.mxu0 %v218_v46  ;;  %342 = vmatpush.msra.mxu2 %v249_v48  ;;  %v1116_v10 = vld [vmem:[%s1061_s17 + $0x20] sm:$0xff]  ;;  %v1126_v12 = vld [vmem:[%s1061_s17 + $0x50] sm:$0xff]  ;;  %v1129_v13 = vld [vmem:[%s1061_s17 + $0x58] sm:$0xff] }
  0x25   : > { %315 = vmatpush.msra.mxu1 %v234_v47  ;;  %368 = vmatpush.msra.mxu3 %v265_v49  ;;  %v1132_v14 = vld [vmem:[%s1061_s17 + $0x40] sm:$0xff]  ;;  %v1135_v15 = vld [vmem:[%s1061_s17 + $0x48] sm:$0xff]  ;;  %v770_v16 = vld [vmem:[%s1418_s2 + $0x358] sm:$0xff] }
  0x26   : > { %290 = vmatpush.msra.mxu0 %v217_v50  ;;  %343 = vmatpush.msra.mxu2 %v248_v52  ;;  %v769_v17 = vld [vmem:[%s1418_s2 + $0x350] sm:$0xff]  ;;  %v758_v18 = vld [vmem:[%s1418_s2 + $0x2f8] sm:$0xff]  ;;  %v768_v19 = vld [vmem:[%s1418_s2 + $0x348] sm:$0xff] }
  0x27   : > { %316 = vmatpush.msra.mxu1 %v233_v51  ;;  %369 = vmatpush.msra.mxu3 %v264_v53  ;;  %v757_v20 = vld [vmem:[%s1418_s2 + $0x2f0] sm:$0xff]  ;;  %v767_v21 = vld [vmem:[%s1418_s2 + $0x340] sm:$0xff]  ;;  %v756_v22 = vld [vmem:[%s1418_s2 + $0x2e8] sm:$0xff] }
  0x28   : > { %291 = vmatpush.msra.mxu0 %v216_v54  ;;  %344 = vmatpush.msra.mxu2 %v247_v56  ;;  %v766_v23 = vld [vmem:[%s1418_s2 + $0x338] sm:$0xff]  ;;  %v755_v25 = vld [vmem:[%s1418_s2 + $0x2e0] sm:$0xff]  ;;  %v765_v26 = vld [vmem:[%s1418_s2 + $0x330] sm:$0xff] }
  0x29   : > { %317 = vmatpush.msra.mxu1 %v232_v55  ;;  %370 = vmatpush.msra.mxu3 %v263_v57  ;;  %v742_v24 = vld [vmem:[%s1418_s2 + $0x278] sm:$0xff]  ;;  %v741_v27 = vld [vmem:[%s1418_s2 + $0x270] sm:$0xff]  ;;  %v764_v29 = vld [vmem:[%s1418_s2 + $0x328] sm:$0xff] }
  0x2a   : > { %292 = vmatpush.msra.mxu0 %v215_v58  ;;  %345 = vmatpush.msra.mxu2 %v246_v60  ;;  %v754_v28 = vld [vmem:[%s1418_s2 + $0x2d8] sm:$0xff]  ;;  %v740_v30 = vld [vmem:[%s1418_s2 + $0x268] sm:$0xff]  ;;  %v753_v31 = vld [vmem:[%s1418_s2 + $0x2d0] sm:$0xff] }
  0x2b   : > { %318 = vmatpush.msra.mxu1 %v231_v59  ;;  %371 = vmatpush.msra.mxu3 %v262_v61  ;;  %v763_v32 = vld [vmem:[%s1418_s2 + $0x320] sm:$0xff]  ;;  %v752_v34 = vld [vmem:[%s1418_s2 + $0x2c8] sm:$0xff]  ;;  %v762_v35 = vld [vmem:[%s1418_s2 + $0x318] sm:$0xff] }
  0x2c   : > { %346 = vmatmul.f32.vlgmr.msra.gmra.mxu2 %v1076_v62  ;;  %372 = vmatmul.f32.vlgmr.msra.gmra.mxu3 %v1079_v63  ;;  %v739_v33 = vld [vmem:[%s1418_s2 + $0x260] sm:$0xff]  ;;  %v738_v36 = vld [vmem:[%s1418_s2 + $0x258] sm:$0xff]  ;;  %v761_v38 = vld [vmem:[%s1418_s2 + $0x310] sm:$0xff] }
  0x2d   : > { %293 = vmatpush.msra.mxu0 %v214_v0  ;;  %319 = vmatpush.msra.mxu1 %v230_v1  ;;  %v751_v37 = vld [vmem:[%s1418_s2 + $0x2c0] sm:$0xff]  ;;  %v737_v39 = vld [vmem:[%s1418_s2 + $0x250] sm:$0xff]  ;;  %v750_v40 = vld [vmem:[%s1418_s2 + $0x2b8] sm:$0xff] }
  0x2e   : > { %294 = vmatmul.f32.vlgmr.msra.gmra.mxu0 %v1088_v2  ;;  %320 = vmatmul.f32.vlgmr.msra.gmra.mxu1 %v1091_v3  ;;  %v760_v41 = vld [vmem:[%s1418_s2 + $0x308] sm:$0xff]  ;;  %v749_v43 = vld [vmem:[%s1418_s2 + $0x2b0] sm:$0xff]  ;;  %v759_v44 = vld [vmem:[%s1418_s2 + $0x300] sm:$0xff] }
  0x2f   : > { %549 = vmatpush.msrb.mxu3 %v774_v4  ;;  %523 = vmatpush.msrb.mxu2 %v758_v18  ;;  %v736_v42 = vld [vmem:[%s1418_s2 + $0x248] sm:$0xff]  ;;  %v735_v45 = vld [vmem:[%s1418_s2 + $0x240] sm:$0xff]  ;;  %v1237_v47 = vld [vmem:[%s1418_s2 + $0x3f8] sm:$0xff] }
  0x30   : > { %497 = vmatpush.msrb.mxu1 %v742_v24  ;;  %v748_v46 = vld [vmem:[%s1418_s2 + $0x2a8] sm:$0xff]  ;;  %v734_v48 = vld [vmem:[%s1418_s2 + $0x238] sm:$0xff]  ;;  %v747_v49 = vld [vmem:[%s1418_s2 + $0x2a0] sm:$0xff] }
  0x31   : > { %550 = vmatpush.msrb.mxu3 %v773_v5  ;;  %524 = vmatpush.msrb.mxu2 %v757_v20  ;;  %v1249_v50 = vld [vmem:[%s1418_s2 + $0x3f0] sm:$0xff]  ;;  %v746_v52 = vld [vmem:[%s1418_s2 + $0x298] sm:$0xff]  ;;  %v1261_v53 = vld [vmem:[%s1418_s2 + $0x3e8] sm:$0xff] }
  0x32   : > { %498 = vmatpush.msrb.mxu1 %v741_v27  ;;  %v733_v51 = vld [vmem:[%s1418_s2 + $0x230] sm:$0xff]  ;;  %v732_v54 = vld [vmem:[%s1418_s2 + $0x228] sm:$0xff]  ;;  %v1273_v56 = vld [vmem:[%s1418_s2 + $0x3e0] sm:$0xff] }
  0x33   : > { %551 = vmatpush.msrb.mxu3 %v772_v6  ;;  %525 = vmatpush.msrb.mxu2 %v756_v22  ;;  %v745_v55 = vld [vmem:[%s1418_s2 + $0x290] sm:$0xff]  ;;  %v731_v57 = vld [vmem:[%s1418_s2 + $0x220] sm:$0xff]  ;;  %v744_v58 = vld [vmem:[%s1418_s2 + $0x288] sm:$0xff] }
  0x34   : > { %349 = vmatmul.f32.gmra.mxu2 %v1107_v7  ;;  %375 = vmatmul.f32.gmra.mxu3 %v1110_v8  ;;  %v1285_v61 = vld [vmem:[%s1418_s2 + $0x3d8] sm:$0xff]  ;;  %v743_v1 = vld [vmem:[%s1418_s2 + $0x280] sm:$0xff]  ;;  %v1298_v4 = vld [vmem:[%s1418_s2 + $0x3d0] sm:$0xff] }
  0x35   : > { %552 = vmatpush.msrb.mxu3 %v771_v9  ;;  %526 = vmatpush.msrb.mxu2 %v755_v25  ;;  %v730_v0 = vld [vmem:[%s1418_s2 + $0x218] sm:$0xff]  ;;  %v1307_v9 = vld [vmem:[%s1418_s2 + $0x3c8] sm:$0xff]  ;;  %v727_v18 = vld [vmem:[%s1418_s2 + $0x200] sm:$0xff] }
  0x36   : > { %297 = vmatmul.f32.gmra.mxu0 %v1116_v10  ;;  %323 = vmatmul.f32.gmra.mxu1 %v1119_v11  ;;  %v780_v24 = vld [vmem:[%s1418_s2 + $0x3a8] sm:$0xff] }
  0x37   : > { %553 = vmatpush.msrb.mxu3 %v770_v16  ;;  %527 = vmatpush.msrb.mxu2 %v754_v28  ;;  %v728_v16 = vld [vmem:[%s1418_s2 + $0x208] sm:$0xff] }
  0x38   : > { %499 = vmatpush.msrb.mxu1 %v740_v30 }
  0x39   : > { %554 = vmatpush.msrb.mxu3 %v769_v17  ;;  %528 = vmatpush.msrb.mxu2 %v753_v31  ;;  %v783_v17 = vld [vmem:[%s1418_s2 + $0x3c0] sm:$0xff] }
  0x3a   : > { %500 = vmatpush.msrb.mxu1 %v739_v33 }
  0x3b   : > { %555 = vmatpush.msrb.mxu3 %v768_v19  ;;  %529 = vmatpush.msrb.mxu2 %v752_v34 }
  0x3c   : > { %352 = vmatmul.f32.gmra.mxu2 %v1126_v12  ;;  %378 = vmatmul.f32.gmra.mxu3 %v1129_v13 }
  0x3d   : > { %556 = vmatpush.msrb.mxu3 %v767_v21  ;;  %501 = vmatpush.msrb.mxu1 %v738_v36  ;;  %v781_v21 = vld [vmem:[%s1418_s2 + $0x3b0] sm:$0xff] }
  0x3e   : > { %300 = vmatmul.f32.gmra.mxu0 %v1132_v14  ;;  %326 = vmatmul.f32.gmra.mxu1 %v1135_v15 }
  0x3f   : > { %557 = vmatpush.msrb.mxu3 %v766_v23  ;;  %530 = vmatpush.msrb.mxu2 %v751_v37 }
  0x40   : > { %502 = vmatpush.msrb.mxu1 %v737_v39 }
  0x41   : > { %558 = vmatpush.msrb.mxu3 %v765_v26  ;;  %531 = vmatpush.msrb.mxu2 %v750_v40  ;;  %v778_v26 = vld [vmem:[%s1418_s2 + $0x398] sm:$0xff] }
  0x42   : > { %503 = vmatpush.msrb.mxu1 %v736_v42 }
  0x43   : > { %559 = vmatpush.msrb.mxu3 %v764_v29  ;;  %532 = vmatpush.msrb.mxu2 %v749_v43 }
  0x44   : > { %504 = vmatpush.msrb.mxu1 %v735_v45 }
  0x45   : > { %560 = vmatpush.msrb.mxu3 %v763_v32  ;;  %533 = vmatpush.msrb.mxu2 %v748_v46  ;;  %v776_v32 = vld [vmem:[%s1418_s2 + $0x388] sm:$0xff] }
  0x46   : > { %505 = vmatpush.msrb.mxu1 %v734_v48 }
  0x47   : > { %561 = vmatpush.msrb.mxu3 %v762_v35  ;;  %534 = vmatpush.msrb.mxu2 %v747_v49 }
  0x48   : > { %506 = vmatpush.msrb.mxu1 %v733_v51 }
  0x49   : > { %562 = vmatpush.msrb.mxu3 %v761_v38  ;;  %535 = vmatpush.msrb.mxu2 %v746_v52  ;;  %v385_v38 = vld [vmem:[%s1417_s1 + $0x18] sm:$0xff] }
  0x4a   : > { %507 = vmatpush.msrb.mxu1 %v732_v54 }
  0x4b   : > { %563 = vmatpush.msrb.mxu3 %v760_v41  ;;  %536 = vmatpush.msrb.mxu2 %v745_v55 }
  0x4c   : > { %508 = vmatpush.msrb.mxu1 %v731_v57 }
  0x4d   : > { %564 = vmatpush.msrb.mxu3 %v759_v44  ;;  %537 = vmatpush.msrb.mxu2 %v744_v58 }
  0x4e   : > { %565 = vmatmul.f32.vlgmr.msrb.gmra.mxu3 %v1076_v62  ;;  %509 = vmatpush.msrb.mxu1 %v730_v0  ;;  %v729_v62 = vld [vmem:[%s1418_s2 + $0x210] sm:$0xff]  ;;  %v791_v0 = vld [vmem:[%s1417_s1 + $0x20] sm:$0xff] }
  0x4f   : > { %802 = vmatpush.msra.mxu3 %v1237_v47  ;;  %538 = vmatpush.msrb.mxu2 %v743_v1  ;;  %v793_v1 = vld [vmem:[%s1417_s1 + $0x30] sm:$0xff] }
  0x50   : > { %539 = vmatmul.f32.vlgmr.msrb.gmra.mxu2 %v1091_v3  ;;  %510 = vmatpush.msrb.mxu1 %v729_v62  ;;  %v782_v3 = vld [vmem:[%s1418_s2 + $0x3b8] sm:$0xff] }
  0x51   : > { %803 = vmatpush.msra.mxu3 %v1249_v50  ;;  %v794_v62 = vld [vmem:[%s1417_s1 + $0x38] sm:$0xff] }
  0x52   : > { %511 = vmatpush.msrb.mxu1 %v728_v16 }
  0x53   : > { %804 = vmatpush.msra.mxu3 %v1261_v53 }
  0x54   : > { %512 = vmatpush.msrb.mxu1 %v727_v18 }
  0x55   : > { %805 = vmatpush.msra.mxu3 %v1273_v56  ;;  %513 = vmatmul.f32.vlgmr.msrb.gmra.mxu1 %v1088_v2 }
  0x56   : > { %568 = vmatmul.f32.gmra.mxu3 %v1107_v7  ;;  %v779_v7 = vld [vmem:[%s1418_s2 + $0x3a0] sm:$0xff] }
  0x57   : > { %806 = vmatpush.msra.mxu3 %v1285_v61 }
  0x58   : > { %542 = vmatmul.f32.gmra.mxu2 %v1119_v11  ;;  %v777_v11 = vld [vmem:[%s1418_s2 + $0x390] sm:$0xff] }
  0x59   : > { %807 = vmatpush.msra.mxu3 %v1298_v4 }
  0x5b   : > { %808 = vmatpush.msra.mxu3 %v1307_v9 }
  0x5d   : > { %809 = vmatpush.msra.mxu3 %v783_v17  ;;  %516 = vmatmul.f32.gmra.mxu1 %v1116_v10  ;;  %v775_v10 = vld [vmem:[%s1418_s2 + $0x380] sm:$0xff] }
  0x5e   : > { %571 = vmatmul.f32.gmra.mxu3 %v1126_v12 }
  0x5f   : > { %810 = vmatpush.msra.mxu3 %v782_v3 }
  0x60   : > { %545 = vmatmul.f32.gmra.mxu2 %v1135_v15  ;;  %v382_v15 = vld [vmem:[%s1417_s1] sm:$0xff] }
  0x61   : > { %811 = vmatpush.msra.mxu3 %v781_v21 }
  0x63   : > { %812 = vmatpush.msra.mxu3 %v780_v24 }
  0x65   : > { %813 = vmatpush.msra.mxu3 %v779_v7  ;;  %519 = vmatmul.f32.gmra.mxu1 %v1132_v14  ;;  %v384_v14 = vld [vmem:[%s1417_s1 + $0x10] sm:$0xff] }
  0x67   : > { %814 = vmatpush.msra.mxu3 %v778_v26 }
  0x69   : > { %815 = vmatpush.msra.mxu3 %v777_v11 }
  0x6b   : > { %816 = vmatpush.msra.mxu3 %v776_v32 }
  0x6d   : > { %817 = vmatpush.msra.mxu3 %v775_v10 }
  0x6e   : > { %597 = vmatmul.f32.vlgmr.msra.gmra.mxu3 %v1129_v13  ;;  %v383_v13 = vld [vmem:[%s1417_s1 + $0x8] sm:$0xff] }
  0xab   : > { %v295_v59 = vpop.f32.mrf.mxu0  ;;  %v321_v60 = vpop.f32.mrf.mxu1 }
  0xac   : > { %v322_v29 = vadd.f32 %v321_v60, %v295_v59 }
  0xaf   : > { %v347_v5 = vpop.f32.mrf.mxu2  ;;  %v373_v6 = vpop.f32.mrf.mxu3 }
  0xb0   : > { %v348_v12 = vadd.f32 %v347_v5, %v322_v29  ;;  %v210_v5 = vld [vmem:[%s1419_s3] sm:$0xff] }
  0xb2   : > { %v374_v37 = vadd.f32 %v373_v6, %v348_v12 }
  0xb3   : > { %v298_v19 = vpop.f32.mrf.mxu0  ;;  %v324_v20 = vpop.f32.mrf.mxu1 }
  0xb4   : > { %v325_v27 = vadd.f32 %v324_v20, %v298_v19  ;;  %v211_v19 = vld [vmem:[%s1419_s3 + $0x8] sm:$0xff] }
  0xb7   : > { %v350_v22 = vpop.f32.mrf.mxu2  ;;  %v376_v23 = vpop.f32.mrf.mxu3 }
  0xb8   : > { %v351_v33 = vadd.f32 %v350_v22, %v325_v27 }
  0xba   : > { %v377_v36 = vadd.f32 %v376_v23, %v351_v33 }
  0xbb   : > { %v301_v25 = vpop.f32.mrf.mxu0  ;;  %v327_v2 = vpop.f32.mrf.mxu1 }
  0xbc   : > { %v328_v28 = vadd.f32 %v327_v2, %v301_v25  ;;  %v213_v25 = vld [vmem:[%s1419_s3 + $0x18] sm:$0xff] }
  0xbf   : > { %v353_v30 = vpop.f32.mrf.mxu2  ;;  %v379_v31 = vpop.f32.mrf.mxu3 }
  0xc0   : > { %v354_v34 = vadd.f32 %v353_v30, %v328_v28 }
  0xc2   : > { %v380_v35 = vadd.f32 %v379_v31, %v354_v34 }
  0xc4   : > { %412 = vmatpush.msrb.mxu0 %v380_v35 }
  0xc6   : > { %413 = vmatpush.msrb.mxu0 %v377_v36 }
  0xc8   : > { %414 = vmatpush.msrb.mxu0 %v374_v37 }
  0xc9   : > { %723 = vmatmul.msk.f32.vlgmr.msrb.gmra.mxu0 %vm386_vm0, %v382_v15 }
  0xca   : > { %575 = vmatpush.msra.mxu0 %v1237_v47 }
  0xcc   : > { %576 = vmatpush.msra.mxu0 %v1249_v50 }
  0xce   : > { %577 = vmatpush.msra.mxu0 %v1261_v53 }
  0xd0   : > { %578 = vmatpush.msra.mxu0 %v1273_v56 }
  0xd1   : > { %724 = vmatmul.msk.f32.gmra.mxu0 %vm386_vm0, %v383_v13  ;;  %v566_v39 = vpop.f32.mrf.mxu3 }
  0xd2   : > { %579 = vmatpush.msra.mxu0 %v1285_v61  ;;  %v514_v40 = vpop.f32.mrf.mxu1 }
  0xd3   : > { %v540_v41 = vpop.f32.mrf.mxu2 }
  0xd4   : > { %580 = vmatpush.msra.mxu0 %v1298_v4  ;;  %v541_v56 = vadd.f32 %v540_v41, %v514_v40  ;;  %v792_v4 = vld [vmem:[%s1417_s1 + $0x28] sm:$0xff] }
  0xd6   : > { %581 = vmatpush.msra.mxu0 %v1307_v9  ;;  %v567_v59 = vadd.f32 %v566_v39, %v541_v56 }
  0xd8   : > { %582 = vmatpush.msra.mxu0 %v783_v17  ;;  %v212_v17 = vld [vmem:[%s1419_s3 + $0x10] sm:$0xff] }
  0xd9   : > { %725 = vmatmul.msk.f32.gmra.mxu0 %vm386_vm0, %v384_v14  ;;  %v569_v42 = vpop.f32.mrf.mxu3 }
  0xda   : > { %583 = vmatpush.msra.mxu0 %v782_v3  ;;  %v517_v43 = vpop.f32.mrf.mxu1 }
  0xdb   : > { %v543_v44 = vpop.f32.mrf.mxu2 }
  0xdc   : > { %584 = vmatpush.msra.mxu0 %v781_v21  ;;  %v544_v55 = vadd.f32 %v543_v44, %v517_v43 }
  0xde   : > { %585 = vmatpush.msra.mxu0 %v780_v24  ;;  %v570_v57 = vadd.f32 %v569_v42, %v544_v55 }
  0xe0   : > { %586 = vmatpush.msra.mxu0 %v779_v7 }
  0xe1   : > { %726 = vmatmul.msk.f32.gmra.mxu0 %vm386_vm0, %v385_v38  ;;  %v572_v45 = vpop.f32.mrf.mxu3 }
  0xe2   : > { %587 = vmatpush.msra.mxu0 %v778_v26  ;;  %v520_v46 = vpop.f32.mrf.mxu1 }
  0xe3   : > { %v546_v47 = vpop.f32.mrf.mxu2 }
  0xe4   : > { %588 = vmatpush.msra.mxu0 %v777_v11  ;;  %v547_v48 = vadd.f32 %v546_v47, %v520_v46 }
  0xe6   : > { %589 = vmatpush.msra.mxu0 %v776_v32  ;;  %v573_v50 = vadd.f32 %v572_v45, %v547_v48 }
  0xe8   : > { %590 = vmatpush.msra.mxu0 %v775_v10 }
  0xe9   : > { %591 = vmatmul.f32.vlgmr.msra.gmra.mxu0 %v1079_v63 }
  0xf1   : > { %594 = vmatmul.f32.gmra.mxu0 %v1110_v8  ;;  %v598_v51 = vpop.f32.mrf.mxu3 }
  0xf2   : > { %v599_v52 = vadd.f32 %v598_v51, %v573_v50 }
  0xf4   : > { %631 = vmatpush.msra.mxu1 %v599_v52  ;;  %818 = vmatpush.msra.mxu2 %v599_v52 }
 0x146   : > { %v416_v49 = vpop.f32.mrf.mxu0 }
 0x147   : > { %v428_v6 = vadd.f32 %v416_v49, %v210_v5 }
 0x14e   : > { %v419_v53 = vpop.f32.mrf.mxu0 }
 0x14f   : > { %v429_v21 = vadd.f32 %v419_v53, %v211_v19 }
 0x156   : > { %v422_v63 = vpop.f32.mrf.mxu0 }
 0x157   : > { %v430_v20 = vadd.f32 %v422_v63, %v212_v17 }
 0x15e   : > { %v425_v54 = vpop.f32.mrf.mxu0 }
 0x15f   : > { %v431_v26 = vadd.f32 %v425_v54, %v213_v25 }
 0x166   : > { %v592_v8 = vpop.f32.mrf.mxu0 }
 0x167   : > { %v593_v61 = vadd.f32 %v592_v8, %v567_v59 }
 0x16e   : > { %v595_v58 = vpop.f32.mrf.mxu0 }
 0x16f   : > { %v596_v60 = vadd.f32 %v595_v58, %v570_v57 }
 0x171   : > { %632 = vmatpush.msra.mxu1 %v596_v60  ;;  %819 = vmatpush.msra.mxu2 %v596_v60 }
 0x173   : > { %633 = vmatpush.msra.mxu1 %v593_v61  ;;  %820 = vmatpush.msra.mxu2 %v593_v61 }
 0x174   : > { %795 = vmatmul.msk.f32.vlgmr.msra.gmra.mxu1 %vm386_vm0, %v791_v0  ;;  %797 = vmatmul.msk.f32.vlgmr.msra.gmra.mxu2 %vm386_vm0, %v793_v1 }
 0x17c   : > { %796 = vmatmul.msk.f32.gmra.mxu1 %vm386_vm0, %v792_v4  ;;  %798 = vmatmul.msk.f32.gmra.mxu2 %vm386_vm0, %v794_v62 }
 0x1f1   : > { %v635_v9 = vpop.f32.mrf.mxu1 }
 0x1f2   : > { %v647_v16 = vadd.f32 %v635_v9, %v428_v6 }
 0x1f4   : > { %v651_v18 = vmax.f32 %v647_v16, 0.0 }
 0x1f6   : > { %656 = vst.msk [vmem:[%s197_s11] sm:$0xff] %vm655_vm1, %v651_v18 }
 0x1f7   : > { %v641_v3 = vpop.f32.mrf.mxu2 }
 0x1f8   : > { %v649_v22 = vadd.f32 %v641_v3, %v430_v20 }
 0x1f9   : > { %v638_v23 = vpop.f32.mrf.mxu1 }
 0x1fa   : > { %v653_v24 = vmax.f32 %v649_v22, 0.0  ;;  %v648_v7 = vadd.f32 %v638_v23, %v429_v21 }
 0x1fc   : > { %658 = vst.msk [vmem:[%s197_s11 + $0x10] sm:$0xff] %vm655_vm1, %v653_v24  ;;  %v652_v2 = vmax.f32 %v648_v7, 0.0 }
 0x1fe   : > { %657 = vst.msk [vmem:[%s197_s11 + $0x8] sm:$0xff] %vm655_vm1, %v652_v2 }
 0x1ff   : > { %v644_v27 = vpop.f32.mrf.mxu2 }
 0x200   : > { %v650_v28 = vadd.f32 %v644_v27, %v431_v26 }
 0x202   : > { %v654_v11 = vmax.f32 %v650_v28, 0.0 }
 0x204   : > { %659 = vst.msk [vmem:[%s197_s11 + $0x18] sm:$0xff] %vm655_vm1, %v654_v11 }
 0x205 PF: > { %s14_s15 = sadd.s32 1, %s836_s15  }
 0x206   : > { %p11_p4 = scmp.ge.s32.totalorder %s14_s15, 4  }
 0x208   :  { %13 = sbr.rel (!%p11_p4) target bundleno = 1 (0x1), region = 68 }

// kernel: basic_tt_forward.3
= control target key start
LH: loop header
LB: loop body
LE: loop exit
PB: predicated region body
PF: predicated region fallthrough
CT: control target
= control target key end

     0   :  { %s1679_s0 = inlined_call_operand.vmem [shape: f32[2,2048], index: 0, kind: input, shape index: {}]   ;;  %s1680_s1 = inlined_call_operand.vmem [shape: f32[2048,64], index: 1, kind: input, shape index: {}]   ;;  %s1681_s2 = inlined_call_operand.vmem [shape: f32[1,64], index: 2, kind: input, shape index: {}]   ;;  %s1682_s3 = inlined_call_operand.vmem [shape: f32[64,32], index: 3, kind: input, shape index: {}]   ;;  %s1683_s4 = inlined_call_operand.vmem [shape: f32[1,32], index: 4, kind: input, shape index: {}]   ;;  %s1684_s5 = inlined_call_operand.vmem [shape: f32[32,2], index: 5, kind: input, shape index: {}]   ;;  %s1685_s6 = inlined_call_operand.vmem [shape: f32[1,2], index: 6, kind: input, shape index: {}]   ;;  %s1686_s7 = inlined_call_operand.hbm [shape: f32[2,2], index: 7, kind: output, shape index: {}]  }
   0x1   :  { %v46_v0 = vld [vmem:[%s1680_s1 + $0x78] sm:$0xff]  ;;  %v45_v2 = vld [vmem:[%s1680_s1 + $0x70] sm:$0xff]  ;;  %v44_v6 = vld [vmem:[%s1680_s1 + $0x68] sm:$0xff] }
   0x2   :  { %v78_v1 = vld [vmem:[%s1680_s1 + $0x178] sm:$0xff]  ;;  %332 = vmatpush.msra.mxu0 %v46_v0  ;;  %v77_v4 = vld [vmem:[%s1680_s1 + $0x170] sm:$0xff]  ;;  %v76_v8 = vld [vmem:[%s1680_s1 + $0x168] sm:$0xff] }
   0x3   :  { %372 = vmatpush.msra.mxu2 %v78_v1  ;;  %v62_v3 = vld [vmem:[%s1680_s1 + $0xf8] sm:$0xff]  ;;  %v61_v7 = vld [vmem:[%s1680_s1 + $0xf0] sm:$0xff]  ;;  %v60_v10 = vld [vmem:[%s1680_s1 + $0xe8] sm:$0xff] }
   0x4   :  { %v94_v5 = vld [vmem:[%s1680_s1 + $0x1f8] sm:$0xff]  ;;  %352 = vmatpush.msra.mxu1 %v62_v3  ;;  %333 = vmatpush.msra.mxu0 %v45_v2  ;;  %v93_v9 = vld [vmem:[%s1680_s1 + $0x1f0] sm:$0xff]  ;;  %v43_v11 = vld [vmem:[%s1680_s1 + $0x60] sm:$0xff] }
   0x5   :  { %392 = vmatpush.msra.mxu3 %v94_v5  ;;  %373 = vmatpush.msra.mxu2 %v77_v4  ;;  %v75_v12 = vld [vmem:[%s1680_s1 + $0x160] sm:$0xff]  ;;  %v92_v13 = vld [vmem:[%s1680_s1 + $0x1e8] sm:$0xff]  ;;  %v42_v16 = vld [vmem:[%s1680_s1 + $0x58] sm:$0xff] }
   0x6   :  { %353 = vmatpush.msra.mxu1 %v61_v7  ;;  %334 = vmatpush.msra.mxu0 %v44_v6  ;;  %v59_v14 = vld [vmem:[%s1680_s1 + $0xe0] sm:$0xff]  ;;  %v74_v17 = vld [vmem:[%s1680_s1 + $0x158] sm:$0xff]  ;;  %v41_v20 = vld [vmem:[%s1680_s1 + $0x50] sm:$0xff] }
   0x7   :  { %393 = vmatpush.msra.mxu3 %v93_v9  ;;  %374 = vmatpush.msra.mxu2 %v76_v8  ;;  %v91_v15 = vld [vmem:[%s1680_s1 + $0x1e0] sm:$0xff]  ;;  %v58_v18 = vld [vmem:[%s1680_s1 + $0xd8] sm:$0xff]  ;;  %v73_v21 = vld [vmem:[%s1680_s1 + $0x150] sm:$0xff] }
   0x8   :  { %354 = vmatpush.msra.mxu1 %v60_v10  ;;  %335 = vmatpush.msra.mxu0 %v43_v11  ;;  %v90_v19 = vld [vmem:[%s1680_s1 + $0x1d8] sm:$0xff]  ;;  %v57_v22 = vld [vmem:[%s1680_s1 + $0xd0] sm:$0xff]  ;;  %v40_v24 = vld [vmem:[%s1680_s1 + $0x48] sm:$0xff] }
   0x9   :  { %394 = vmatpush.msra.mxu3 %v92_v13  ;;  %375 = vmatpush.msra.mxu2 %v75_v12  ;;  %v89_v23 = vld [vmem:[%s1680_s1 + $0x1d0] sm:$0xff]  ;;  %v72_v25 = vld [vmem:[%s1680_s1 + $0x148] sm:$0xff]  ;;  %v39_v28 = vld [vmem:[%s1680_s1 + $0x40] sm:$0xff] }
   0xa   :  { %355 = vmatpush.msra.mxu1 %v59_v14  ;;  %336 = vmatpush.msra.mxu0 %v42_v16  ;;  %v56_v26 = vld [vmem:[%s1680_s1 + $0xc8] sm:$0xff]  ;;  %v71_v29 = vld [vmem:[%s1680_s1 + $0x140] sm:$0xff]  ;;  %v38_v32 = vld [vmem:[%s1680_s1 + $0x38] sm:$0xff] }
   0xb   :  { %395 = vmatpush.msra.mxu3 %v91_v15  ;;  %376 = vmatpush.msra.mxu2 %v74_v17  ;;  %v88_v27 = vld [vmem:[%s1680_s1 + $0x1c8] sm:$0xff]  ;;  %v55_v30 = vld [vmem:[%s1680_s1 + $0xc0] sm:$0xff]  ;;  %v70_v33 = vld [vmem:[%s1680_s1 + $0x138] sm:$0xff] }
   0xc   :  { %356 = vmatpush.msra.mxu1 %v58_v18  ;;  %337 = vmatpush.msra.mxu0 %v41_v20  ;;  %v87_v31 = vld [vmem:[%s1680_s1 + $0x1c0] sm:$0xff]  ;;  %v54_v34 = vld [vmem:[%s1680_s1 + $0xb8] sm:$0xff]  ;;  %v37_v36 = vld [vmem:[%s1680_s1 + $0x30] sm:$0xff] }
   0xd   :  { %396 = vmatpush.msra.mxu3 %v90_v19  ;;  %377 = vmatpush.msra.mxu2 %v73_v21  ;;  %v86_v35 = vld [vmem:[%s1680_s1 + $0x1b8] sm:$0xff]  ;;  %v69_v37 = vld [vmem:[%s1680_s1 + $0x130] sm:$0xff]  ;;  %v36_v40 = vld [vmem:[%s1680_s1 + $0x28] sm:$0xff] }
   0xe   :  { %357 = vmatpush.msra.mxu1 %v57_v22  ;;  %338 = vmatpush.msra.mxu0 %v40_v24  ;;  %v53_v38 = vld [vmem:[%s1680_s1 + $0xb0] sm:$0xff]  ;;  %v68_v41 = vld [vmem:[%s1680_s1 + $0x128] sm:$0xff]  ;;  %v35_v44 = vld [vmem:[%s1680_s1 + $0x20] sm:$0xff] }
   0xf   :  { %397 = vmatpush.msra.mxu3 %v89_v23  ;;  %378 = vmatpush.msra.mxu2 %v72_v25  ;;  %v85_v39 = vld [vmem:[%s1680_s1 + $0x1b0] sm:$0xff]  ;;  %v52_v42 = vld [vmem:[%s1680_s1 + $0xa8] sm:$0xff]  ;;  %v67_v45 = vld [vmem:[%s1680_s1 + $0x120] sm:$0xff] }
  0x10   :  { %358 = vmatpush.msra.mxu1 %v56_v26  ;;  %339 = vmatpush.msra.mxu0 %v39_v28  ;;  %v84_v43 = vld [vmem:[%s1680_s1 + $0x1a8] sm:$0xff]  ;;  %v51_v46 = vld [vmem:[%s1680_s1 + $0xa0] sm:$0xff]  ;;  %v34_v48 = vld [vmem:[%s1680_s1 + $0x18] sm:$0xff] }
  0x11   :  { %398 = vmatpush.msra.mxu3 %v88_v27  ;;  %379 = vmatpush.msra.mxu2 %v71_v29  ;;  %v83_v47 = vld [vmem:[%s1680_s1 + $0x1a0] sm:$0xff]  ;;  %v66_v49 = vld [vmem:[%s1680_s1 + $0x118] sm:$0xff]  ;;  %v33_v52 = vld [vmem:[%s1680_s1 + $0x10] sm:$0xff] }
  0x12   :  { %359 = vmatpush.msra.mxu1 %v55_v30  ;;  %340 = vmatpush.msra.mxu0 %v38_v32  ;;  %v50_v50 = vld [vmem:[%s1680_s1 + $0x98] sm:$0xff]  ;;  %v65_v53 = vld [vmem:[%s1680_s1 + $0x110] sm:$0xff]  ;;  %v32_v56 = vld [vmem:[%s1680_s1 + $0x8] sm:$0xff] }
  0x13   :  { %399 = vmatpush.msra.mxu3 %v87_v31  ;;  %380 = vmatpush.msra.mxu2 %v70_v33  ;;  %v82_v51 = vld [vmem:[%s1680_s1 + $0x198] sm:$0xff]  ;;  %v49_v54 = vld [vmem:[%s1680_s1 + $0x90] sm:$0xff]  ;;  %v64_v57 = vld [vmem:[%s1680_s1 + $0x108] sm:$0xff] }
  0x14   :  { %360 = vmatpush.msra.mxu1 %v54_v34  ;;  %341 = vmatpush.msra.mxu0 %v37_v36  ;;  %v81_v55 = vld [vmem:[%s1680_s1 + $0x190] sm:$0xff]  ;;  %v48_v58 = vld [vmem:[%s1680_s1 + $0x88] sm:$0xff]  ;;  %v31_v60 = vld [vmem:[%s1680_s1] sm:$0xff] }
  0x15   :  { %400 = vmatpush.msra.mxu3 %v86_v35  ;;  %381 = vmatpush.msra.mxu2 %v69_v37  ;;  %v80_v59 = vld [vmem:[%s1680_s1 + $0x188] sm:$0xff]  ;;  %v63_v61 = vld [vmem:[%s1680_s1 + $0x100] sm:$0xff]  ;;  %v110_v62 = vld [vmem:[%s1680_s1 + $0x278] sm:$0xff] }
  0x16   :  { %361 = vmatpush.msra.mxu1 %v53_v38  ;;  %342 = vmatpush.msra.mxu0 %v36_v40  ;;  %v142_v63 = vld [vmem:[%s1680_s1 + $0x378] sm:$0xff]  ;;  %v47_v0 = vld [vmem:[%s1680_s1 + $0x80] sm:$0xff]  ;;  %v109_v2 = vld [vmem:[%s1680_s1 + $0x270] sm:$0xff] }
  0x17   :  { %401 = vmatpush.msra.mxu3 %v85_v39  ;;  %382 = vmatpush.msra.mxu2 %v68_v41  ;;  %v79_v1 = vld [vmem:[%s1680_s1 + $0x180] sm:$0xff]  ;;  %v126_v3 = vld [vmem:[%s1680_s1 + $0x2f8] sm:$0xff]  ;;  %v141_v4 = vld [vmem:[%s1680_s1 + $0x370] sm:$0xff] }
  0x18   :  { %362 = vmatpush.msra.mxu1 %v52_v42  ;;  %343 = vmatpush.msra.mxu0 %v35_v44  ;;  %v158_v5 = vld [vmem:[%s1680_s1 + $0x3f8] sm:$0xff]  ;;  %v108_v6 = vld [vmem:[%s1680_s1 + $0x268] sm:$0xff]  ;;  %v125_v7 = vld [vmem:[%s1680_s1 + $0x2f0] sm:$0xff] }
  0x19   :  { %402 = vmatpush.msra.mxu3 %v84_v43  ;;  %383 = vmatpush.msra.mxu2 %v67_v45  ;;  %v140_v8 = vld [vmem:[%s1680_s1 + $0x368] sm:$0xff]  ;;  %v157_v9 = vld [vmem:[%s1680_s1 + $0x3f0] sm:$0xff]  ;;  %v107_v10 = vld [vmem:[%s1680_s1 + $0x260] sm:$0xff] }
  0x1a   :  { %363 = vmatpush.msra.mxu1 %v51_v46  ;;  %344 = vmatpush.msra.mxu0 %v34_v48  ;;  %v124_v11 = vld [vmem:[%s1680_s1 + $0x2e8] sm:$0xff]  ;;  %v139_v12 = vld [vmem:[%s1680_s1 + $0x360] sm:$0xff]  ;;  %v106_v14 = vld [vmem:[%s1680_s1 + $0x258] sm:$0xff] }
  0x1b   :  { %403 = vmatpush.msra.mxu3 %v83_v47  ;;  %384 = vmatpush.msra.mxu2 %v66_v49  ;;  %v156_v13 = vld [vmem:[%s1680_s1 + $0x3e8] sm:$0xff]  ;;  %v123_v15 = vld [vmem:[%s1680_s1 + $0x2e0] sm:$0xff]  ;;  %v138_v16 = vld [vmem:[%s1680_s1 + $0x358] sm:$0xff] }
  0x1c   :  { %364 = vmatpush.msra.mxu1 %v50_v50  ;;  %345 = vmatpush.msra.mxu0 %v33_v52  ;;  %v155_v17 = vld [vmem:[%s1680_s1 + $0x3e0] sm:$0xff]  ;;  %v105_v18 = vld [vmem:[%s1680_s1 + $0x250] sm:$0xff]  ;;  %v122_v19 = vld [vmem:[%s1680_s1 + $0x2d8] sm:$0xff] }
  0x1d   :  { %404 = vmatpush.msra.mxu3 %v82_v51  ;;  %385 = vmatpush.msra.mxu2 %v65_v53  ;;  %v137_v20 = vld [vmem:[%s1680_s1 + $0x350] sm:$0xff]  ;;  %v154_v21 = vld [vmem:[%s1680_s1 + $0x3d8] sm:$0xff]  ;;  %v104_v22 = vld [vmem:[%s1680_s1 + $0x248] sm:$0xff] }
  0x1e   :  { %365 = vmatpush.msra.mxu1 %v49_v54  ;;  %346 = vmatpush.msra.mxu0 %v32_v56  ;;  %v121_v23 = vld [vmem:[%s1680_s1 + $0x2d0] sm:$0xff]  ;;  %v136_v24 = vld [vmem:[%s1680_s1 + $0x348] sm:$0xff]  ;;  %v27_v26 = vld [vmem:[%s1679_s0] sm:$0xff] }
  0x1f   :  { %405 = vmatpush.msra.mxu3 %v81_v55  ;;  %386 = vmatpush.msra.mxu2 %v64_v57  ;;  %v153_v25 = vld [vmem:[%s1680_s1 + $0x3d0] sm:$0xff]  ;;  %v103_v27 = vld [vmem:[%s1680_s1 + $0x240] sm:$0xff]  ;;  %v120_v28 = vld [vmem:[%s1680_s1 + $0x2c8] sm:$0xff]  ;;  %295 = vst [vmem:[#allocation1] ss:$4 sm:$0xff] %v27_v26 }
  0x20   :  { %366 = vmatpush.msra.mxu1 %v48_v58  ;;  %347 = vmatpush.msra.mxu0 %v31_v60  ;;  %v135_v29 = vld [vmem:[%s1680_s1 + $0x340] sm:$0xff]  ;;  %v152_v30 = vld [vmem:[%s1680_s1 + $0x3c8] sm:$0xff]  ;;  %v102_v31 = vld [vmem:[%s1680_s1 + $0x238] sm:$0xff] }
  0x21   :  { %406 = vmatpush.msra.mxu3 %v80_v59  ;;  %387 = vmatpush.msra.mxu2 %v63_v61  ;;  %v119_v32 = vld [vmem:[%s1680_s1 + $0x2c0] sm:$0xff]  ;;  %v134_v33 = vld [vmem:[%s1680_s1 + $0x338] sm:$0xff]  ;;  %v101_v35 = vld [vmem:[%s1680_s1 + $0x230] sm:$0xff] }
  0x22   :  { %412 = vmatpush.msrb.mxu0 %v110_v62  ;;  %367 = vmatpush.msra.mxu1 %v47_v0  ;;  %v151_v34 = vld [vmem:[%s1680_s1 + $0x3c0] sm:$0xff]  ;;  %v118_v36 = vld [vmem:[%s1680_s1 + $0x2b8] sm:$0xff]  ;;  %v133_v37 = vld [vmem:[%s1680_s1 + $0x330] sm:$0xff] }
  0x23   :  { %452 = vmatpush.msrb.mxu2 %v142_v63  ;;  %407 = vmatpush.msra.mxu3 %v79_v1  ;;  %v150_v38 = vld [vmem:[%s1680_s1 + $0x3b8] sm:$0xff]  ;;  %v100_v39 = vld [vmem:[%s1680_s1 + $0x228] sm:$0xff]  ;;  %v117_v40 = vld [vmem:[%s1680_s1 + $0x2b0] sm:$0xff] }
  0x24   :  { %413 = vmatpush.msrb.mxu0 %v109_v2  ;;  %432 = vmatpush.msrb.mxu1 %v126_v3  ;;  %v132_v41 = vld [vmem:[%s1680_s1 + $0x328] sm:$0xff]  ;;  %v149_v42 = vld [vmem:[%s1680_s1 + $0x3b0] sm:$0xff]  ;;  %v99_v44 = vld [vmem:[%s1680_s1 + $0x220] sm:$0xff] }
  0x25   :  { %453 = vmatpush.msrb.mxu2 %v141_v4  ;;  %472 = vmatpush.msrb.mxu3 %v158_v5  ;;  %v28_v43 = vld [vmem:[%s1679_s0 + $0x8] sm:$0xff]  ;;  %v29_v46 = vld [vmem:[%s1679_s0 + $0x10] sm:$0xff]  ;;  %v131_v47 = vld [vmem:[%s1680_s1 + $0x320] sm:$0xff] }
  0x26   :  { %414 = vmatpush.msrb.mxu0 %v108_v6  ;;  %433 = vmatpush.msrb.mxu1 %v125_v7  ;;  %v116_v45 = vld [vmem:[%s1680_s1 + $0x2a8] sm:$0xff]  ;;  %297 = vst [vmem:[#allocation1 + $0x20] ss:$4 sm:$0xff] %v28_v43  ;;  %v298_v48 = vld.sshfl [vmem:[#allocation1] sm:$0xff pattern:$0x73625140] }
  0x27   :  { %454 = vmatpush.msrb.mxu2 %v140_v8  ;;  %473 = vmatpush.msrb.mxu3 %v157_v9  ;;  %v300_v49 = vld.sshfl [vmem:[#allocation1 + $0x10] sm:$0xff pattern:$0x73625140]  ;;  %v1166_v50 = vld.sshfl [vmem:[#allocation1 + $0x8] sm:$0xff pattern:$0x73625140] }
  0x28   :  { %415 = vmatpush.msrb.mxu0 %v107_v10  ;;  %434 = vmatpush.msrb.mxu1 %v124_v11  ;;  %v1168_v51 = vld.sshfl [vmem:[#allocation1 + $0x18] sm:$0xff pattern:$0x73625140]  ;;  %v148_v52 = vld [vmem:[%s1680_s1 + $0x3a8] sm:$0xff]  ;;  %v115_v54 = vld [vmem:[%s1680_s1 + $0x2a0] sm:$0xff] }
  0x29   :  { %455 = vmatpush.msrb.mxu2 %v139_v12  ;;  %474 = vmatpush.msrb.mxu3 %v156_v13  ;;  %v98_v53 = vld [vmem:[%s1680_s1 + $0x218] sm:$0xff]  ;;  %306 = vst [vmem:[#allocation1] ss:$4 sm:$0xff] %v29_v46  ;;  %v147_v56 = vld [vmem:[%s1680_s1 + $0x3a0] sm:$0xff]  ;;  %v97_v57 = vld [vmem:[%s1680_s1 + $0x210] sm:$0xff] }
  0x2a   :  { %416 = vmatpush.msrb.mxu0 %v106_v14  ;;  %435 = vmatpush.msrb.mxu1 %v123_v15  ;;  %v130_v55 = vld [vmem:[%s1680_s1 + $0x318] sm:$0xff]  ;;  %v129_v59 = vld [vmem:[%s1680_s1 + $0x310] sm:$0xff]  ;;  %v96_v61 = vld [vmem:[%s1680_s1 + $0x208] sm:$0xff] }
  0x2b   :  { %456 = vmatpush.msrb.mxu2 %v138_v16  ;;  %475 = vmatpush.msrb.mxu3 %v155_v17  ;;  %v114_v58 = vld [vmem:[%s1680_s1 + $0x298] sm:$0xff]  ;;  %v113_v62 = vld [vmem:[%s1680_s1 + $0x290] sm:$0xff]  ;;  %v128_v4 = vld [vmem:[%s1680_s1 + $0x308] sm:$0xff] }
  0x2c   :  { %417 = vmatpush.msrb.mxu0 %v105_v18  ;;  %436 = vmatpush.msrb.mxu1 %v122_v19  ;;  %v146_v60 = vld [vmem:[%s1680_s1 + $0x398] sm:$0xff]  ;;  %v145_v5 = vld [vmem:[%s1680_s1 + $0x390] sm:$0xff]  ;;  %v95_v6 = vld [vmem:[%s1680_s1 + $0x200] sm:$0xff] }
  0x2d   :  { %457 = vmatpush.msrb.mxu2 %v137_v20  ;;  %476 = vmatpush.msrb.mxu3 %v154_v21  ;;  %v30_v63 = vld [vmem:[%s1679_s0 + $0x18] sm:$0xff]  ;;  %v1206_v0 = vld.sshfl [vmem:[#allocation1 + $0x30] sm:$0xff pattern:$0x73625140]  ;;  %v112_v7 = vld [vmem:[%s1680_s1 + $0x288] sm:$0xff] }
  0x2e   :  { %418 = vmatpush.msrb.mxu0 %v104_v22  ;;  %437 = vmatpush.msrb.mxu1 %v121_v23  ;;  %v1208_v1 = vld.sshfl [vmem:[#allocation1 + $0x20] sm:$0xff pattern:$0x73625140]  ;;  %v1210_v2 = vld.sshfl [vmem:[#allocation1 + $0x38] sm:$0xff pattern:$0x73625140] }
  0x2f   :  { %458 = vmatpush.msrb.mxu2 %v136_v24  ;;  %477 = vmatpush.msrb.mxu3 %v153_v25  ;;  %v1212_v3 = vld.sshfl [vmem:[#allocation1 + $0x28] sm:$0xff pattern:$0x73625140]  ;;  %v127_v8 = vld [vmem:[%s1680_s1 + $0x300] sm:$0xff]  ;;  %v174_v10 = vld [vmem:[%s1680_s1 + $0x478] sm:$0xff] }
  0x30   :  { %419 = vmatpush.msrb.mxu0 %v103_v27  ;;  %438 = vmatpush.msrb.mxu1 %v120_v28  ;;  %307 = vst [vmem:[#allocation1 + $0x20] ss:$4 sm:$0xff] %v30_v63  ;;  %v144_v9 = vld [vmem:[%s1680_s1 + $0x388] sm:$0xff]  ;;  %v206_v11 = vld [vmem:[%s1680_s1 + $0x578] sm:$0xff]  ;;  %v111_v12 = vld [vmem:[%s1680_s1 + $0x280] sm:$0xff] }
  0x31   :  { %459 = vmatpush.msrb.mxu2 %v135_v29  ;;  %478 = vmatpush.msrb.mxu3 %v152_v30  ;;  %v143_v13 = vld [vmem:[%s1680_s1 + $0x380] sm:$0xff]  ;;  %v173_v14 = vld [vmem:[%s1680_s1 + $0x470] sm:$0xff]  ;;  %v190_v15 = vld [vmem:[%s1680_s1 + $0x4f8] sm:$0xff] }
  0x32   :  { %420 = vmatpush.msrb.mxu0 %v102_v31  ;;  %439 = vmatpush.msrb.mxu1 %v119_v32  ;;  %v205_v16 = vld [vmem:[%s1680_s1 + $0x570] sm:$0xff]  ;;  %v222_v17 = vld [vmem:[%s1680_s1 + $0x5f8] sm:$0xff]  ;;  %v172_v18 = vld [vmem:[%s1680_s1 + $0x468] sm:$0xff] }
  0x33   :  { %460 = vmatpush.msrb.mxu2 %v134_v33  ;;  %479 = vmatpush.msrb.mxu3 %v151_v34  ;;  %v189_v19 = vld [vmem:[%s1680_s1 + $0x4f0] sm:$0xff]  ;;  %v204_v20 = vld [vmem:[%s1680_s1 + $0x568] sm:$0xff]  ;;  %v171_v22 = vld [vmem:[%s1680_s1 + $0x460] sm:$0xff] }
  0x34   :  { %421 = vmatpush.msrb.mxu0 %v101_v35  ;;  %440 = vmatpush.msrb.mxu1 %v118_v36  ;;  %v221_v21 = vld [vmem:[%s1680_s1 + $0x5f0] sm:$0xff]  ;;  %v188_v23 = vld [vmem:[%s1680_s1 + $0x4e8] sm:$0xff]  ;;  %v203_v24 = vld [vmem:[%s1680_s1 + $0x560] sm:$0xff] }
  0x35   :  { %461 = vmatpush.msrb.mxu2 %v133_v37  ;;  %480 = vmatpush.msrb.mxu3 %v150_v38  ;;  %v220_v25 = vld [vmem:[%s1680_s1 + $0x5e8] sm:$0xff]  ;;  %v170_v26 = vld [vmem:[%s1680_s1 + $0x458] sm:$0xff]  ;;  %v187_v27 = vld [vmem:[%s1680_s1 + $0x4e0] sm:$0xff] }
  0x36   :  { %422 = vmatpush.msrb.mxu0 %v100_v39  ;;  %441 = vmatpush.msrb.mxu1 %v117_v40  ;;  %v202_v28 = vld [vmem:[%s1680_s1 + $0x558] sm:$0xff]  ;;  %v219_v29 = vld [vmem:[%s1680_s1 + $0x5e0] sm:$0xff]  ;;  %v169_v30 = vld [vmem:[%s1680_s1 + $0x450] sm:$0xff] }
  0x37   :  { %462 = vmatpush.msrb.mxu2 %v132_v41  ;;  %481 = vmatpush.msrb.mxu3 %v149_v42  ;;  %v186_v31 = vld [vmem:[%s1680_s1 + $0x4d8] sm:$0xff]  ;;  %v201_v32 = vld [vmem:[%s1680_s1 + $0x550] sm:$0xff] }
  0x38   :  { %423 = vmatpush.msrb.mxu0 %v99_v44  ;;  %442 = vmatpush.msrb.mxu1 %v116_v45 }
  0x39   :  { %463 = vmatpush.msrb.mxu2 %v131_v47  ;;  %482 = vmatpush.msrb.mxu3 %v148_v52 }
  0x3a   :  { %424 = vmatpush.msrb.mxu0 %v98_v53  ;;  %443 = vmatpush.msrb.mxu1 %v115_v54 }
  0x3b   :  { %464 = vmatpush.msrb.mxu2 %v130_v55  ;;  %483 = vmatpush.msrb.mxu3 %v147_v56 }
  0x3c   :  { %425 = vmatpush.msrb.mxu0 %v97_v57  ;;  %444 = vmatpush.msrb.mxu1 %v114_v58 }
  0x3d   :  { %465 = vmatpush.msrb.mxu2 %v129_v59  ;;  %484 = vmatpush.msrb.mxu3 %v146_v60 }
  0x3e   :  { %426 = vmatpush.msrb.mxu0 %v96_v61  ;;  %445 = vmatpush.msrb.mxu1 %v113_v62 }
  0x3f   :  { %466 = vmatpush.msrb.mxu2 %v128_v4  ;;  %485 = vmatpush.msrb.mxu3 %v145_v5 }
  0x40   :  { %427 = vmatpush.msrb.mxu0 %v95_v6  ;;  %446 = vmatpush.msrb.mxu1 %v112_v7 }
  0x41   :  { %467 = vmatpush.msrb.mxu2 %v127_v8  ;;  %486 = vmatpush.msrb.mxu3 %v144_v9 }
  0x42   :  { %348 = vmatmul.f32.vlgmr.msra.gmra.mxu0 %v298_v48  ;;  %388 = vmatmul.f32.vlgmr.msra.gmra.mxu2 %v300_v49 }
  0x43   :  { %492 = vmatpush.msra.mxu0 %v174_v10  ;;  %532 = vmatpush.msra.mxu2 %v206_v11 }
  0x44   :  { %447 = vmatpush.msrb.mxu1 %v111_v12  ;;  %487 = vmatpush.msrb.mxu3 %v143_v13 }
  0x45   :  { %368 = vmatmul.f32.vlgmr.msra.gmra.mxu1 %v1166_v50  ;;  %408 = vmatmul.f32.vlgmr.msra.gmra.mxu3 %v1168_v51 }
  0x46   :  { %493 = vmatpush.msra.mxu0 %v173_v14  ;;  %512 = vmatpush.msra.mxu1 %v190_v15 }
  0x47   :  { %533 = vmatpush.msra.mxu2 %v205_v16  ;;  %552 = vmatpush.msra.mxu3 %v222_v17 }
  0x48   :  { %494 = vmatpush.msra.mxu0 %v172_v18  ;;  %513 = vmatpush.msra.mxu1 %v189_v19 }
  0x49   :  { %534 = vmatpush.msra.mxu2 %v204_v20  ;;  %553 = vmatpush.msra.mxu3 %v221_v21 }
  0x4a   :  { %495 = vmatpush.msra.mxu0 %v171_v22  ;;  %514 = vmatpush.msra.mxu1 %v188_v23 }
  0x4b   :  { %535 = vmatpush.msra.mxu2 %v203_v24  ;;  %554 = vmatpush.msra.mxu3 %v220_v25 }
  0x4c   :  { %468 = vmatmul.f32.vlgmr.msrb.gmra.mxu2 %v1206_v0  ;;  %496 = vmatpush.msra.mxu0 %v170_v26 }
  0x4d   :  { %515 = vmatpush.msra.mxu1 %v187_v27  ;;  %536 = vmatpush.msra.mxu2 %v202_v28 }
  0x4e   :  { %12 = vsyncpa [#allocation3], 0  ;;  %555 = vmatpush.msra.mxu3 %v219_v29  ;;  %428 = vmatmul.f32.vlgmr.msrb.gmra.mxu0 %v1208_v1  ;;  %v218_v33 = vld [vmem:[%s1680_s1 + $0x5d8] sm:$0xff]  ;;  %v168_v34 = vld [vmem:[%s1680_s1 + $0x448] sm:$0xff]  ;;  %vm665_vm0 = vcmask 523264   ;;  %vm698_vm1 = vcmask 261120  }
  0x4f   :  { %488 = vmatmul.f32.vlgmr.msrb.gmra.mxu3 %v1210_v2  ;;  %497 = vmatpush.msra.mxu0 %v169_v30  ;;  %v185_v35 = vld [vmem:[%s1680_s1 + $0x4d0] sm:$0xff]  ;;  %v200_v36 = vld [vmem:[%s1680_s1 + $0x548] sm:$0xff]  ;;  %v167_v38 = vld [vmem:[%s1680_s1 + $0x440] sm:$0xff]  ;;  %vm722_vm2 = vcmask 9216  }
  0x50   :  { %516 = vmatpush.msra.mxu1 %v186_v31  ;;  %537 = vmatpush.msra.mxu2 %v201_v32  ;;  %v217_v37 = vld [vmem:[%s1680_s1 + $0x5d0] sm:$0xff]  ;;  %v184_v39 = vld [vmem:[%s1680_s1 + $0x4c8] sm:$0xff]  ;;  %v199_v40 = vld [vmem:[%s1680_s1 + $0x540] sm:$0xff] }
  0x51   :  { %556 = vmatpush.msra.mxu3 %v218_v33  ;;  %448 = vmatmul.f32.vlgmr.msrb.gmra.mxu1 %v1212_v3  ;;  %v216_v41 = vld [vmem:[%s1680_s1 + $0x5c8] sm:$0xff]  ;;  %v166_v42 = vld [vmem:[%s1680_s1 + $0x438] sm:$0xff]  ;;  %v183_v43 = vld [vmem:[%s1680_s1 + $0x4c0] sm:$0xff] }
  0x52   :  { %498 = vmatpush.msra.mxu0 %v168_v34  ;;  %517 = vmatpush.msra.mxu1 %v185_v35  ;;  %v198_v44 = vld [vmem:[%s1680_s1 + $0x538] sm:$0xff]  ;;  %v215_v45 = vld [vmem:[%s1680_s1 + $0x5c0] sm:$0xff]  ;;  %v165_v46 = vld [vmem:[%s1680_s1 + $0x430] sm:$0xff] }
  0x53   :  { %538 = vmatpush.msra.mxu2 %v200_v36  ;;  %557 = vmatpush.msra.mxu3 %v217_v37  ;;  %v182_v47 = vld [vmem:[%s1680_s1 + $0x4b8] sm:$0xff]  ;;  %v197_v48 = vld [vmem:[%s1680_s1 + $0x530] sm:$0xff]  ;;  %v164_v50 = vld [vmem:[%s1680_s1 + $0x428] sm:$0xff] }
  0x54   :  { %499 = vmatpush.msra.mxu0 %v167_v38  ;;  %518 = vmatpush.msra.mxu1 %v184_v39  ;;  %v214_v49 = vld [vmem:[%s1680_s1 + $0x5b8] sm:$0xff]  ;;  %v181_v51 = vld [vmem:[%s1680_s1 + $0x4b0] sm:$0xff]  ;;  %v196_v52 = vld [vmem:[%s1680_s1 + $0x528] sm:$0xff] }
  0x55   :  { %539 = vmatpush.msra.mxu2 %v199_v40  ;;  %558 = vmatpush.msra.mxu3 %v216_v41  ;;  %v213_v53 = vld [vmem:[%s1680_s1 + $0x5b0] sm:$0xff]  ;;  %v163_v54 = vld [vmem:[%s1680_s1 + $0x420] sm:$0xff]  ;;  %v180_v55 = vld [vmem:[%s1680_s1 + $0x4a8] sm:$0xff] }
  0x56   :  { %500 = vmatpush.msra.mxu0 %v166_v42  ;;  %519 = vmatpush.msra.mxu1 %v183_v43  ;;  %v195_v56 = vld [vmem:[%s1680_s1 + $0x520] sm:$0xff]  ;;  %v212_v57 = vld [vmem:[%s1680_s1 + $0x5a8] sm:$0xff]  ;;  %v162_v58 = vld [vmem:[%s1680_s1 + $0x418] sm:$0xff] }
  0x57   :  { %540 = vmatpush.msra.mxu2 %v198_v44  ;;  %559 = vmatpush.msra.mxu3 %v215_v45  ;;  %v179_v59 = vld [vmem:[%s1680_s1 + $0x4a0] sm:$0xff]  ;;  %v194_v60 = vld [vmem:[%s1680_s1 + $0x518] sm:$0xff]  ;;  %v161_v62 = vld [vmem:[%s1680_s1 + $0x410] sm:$0xff] }
  0x58   :  { %501 = vmatpush.msra.mxu0 %v165_v46  ;;  %520 = vmatpush.msra.mxu1 %v182_v47  ;;  %v211_v61 = vld [vmem:[%s1680_s1 + $0x5a0] sm:$0xff]  ;;  %v178_v63 = vld [vmem:[%s1680_s1 + $0x498] sm:$0xff]  ;;  %v193_v0 = vld [vmem:[%s1680_s1 + $0x510] sm:$0xff] }
  0x59   :  { %541 = vmatpush.msra.mxu2 %v197_v48  ;;  %560 = vmatpush.msra.mxu3 %v214_v49  ;;  %v210_v1 = vld [vmem:[%s1680_s1 + $0x598] sm:$0xff]  ;;  %v160_v2 = vld [vmem:[%s1680_s1 + $0x408] sm:$0xff]  ;;  %v177_v3 = vld [vmem:[%s1680_s1 + $0x490] sm:$0xff] }
  0x5a   :  { %502 = vmatpush.msra.mxu0 %v164_v50  ;;  %521 = vmatpush.msra.mxu1 %v181_v51  ;;  %v192_v4 = vld [vmem:[%s1680_s1 + $0x508] sm:$0xff]  ;;  %v209_v5 = vld [vmem:[%s1680_s1 + $0x590] sm:$0xff]  ;;  %v159_v6 = vld [vmem:[%s1680_s1 + $0x400] sm:$0xff] }
  0x5b   :  { %542 = vmatpush.msra.mxu2 %v196_v52  ;;  %561 = vmatpush.msra.mxu3 %v213_v53  ;;  %v176_v7 = vld [vmem:[%s1680_s1 + $0x488] sm:$0xff]  ;;  %v191_v8 = vld [vmem:[%s1680_s1 + $0x500] sm:$0xff]  ;;  %v310_v11 = vld.sshfl [vmem:[#allocation1 + $0x10] sm:$0xff pattern:$0x73625140] }
  0x5c   :  { %503 = vmatpush.msra.mxu0 %v163_v54  ;;  %522 = vmatpush.msra.mxu1 %v180_v55  ;;  %v208_v9 = vld [vmem:[%s1680_s1 + $0x588] sm:$0xff]  ;;  %v308_v10 = vld.sshfl [vmem:[#allocation1] sm:$0xff pattern:$0x73625140]  ;;  %v238_v12 = vld [vmem:[%s1680_s1 + $0x678] sm:$0xff] }
  0x5d   :  { %543 = vmatpush.msra.mxu2 %v195_v56  ;;  %562 = vmatpush.msra.mxu3 %v212_v57  ;;  %v270_v13 = vld [vmem:[%s1680_s1 + $0x778] sm:$0xff]  ;;  %v175_v14 = vld [vmem:[%s1680_s1 + $0x480] sm:$0xff]  ;;  %v309_v16 = vld.sshfl [vmem:[#allocation1 + $0x8] sm:$0xff pattern:$0x73625140] }
  0x5e   :  { %504 = vmatpush.msra.mxu0 %v162_v58  ;;  %523 = vmatpush.msra.mxu1 %v179_v59  ;;  %v207_v15 = vld [vmem:[%s1680_s1 + $0x580] sm:$0xff]  ;;  %v311_v17 = vld.sshfl [vmem:[#allocation1 + $0x18] sm:$0xff pattern:$0x73625140]  ;;  %v237_v18 = vld [vmem:[%s1680_s1 + $0x670] sm:$0xff] }
  0x5f   :  { %544 = vmatpush.msra.mxu2 %v194_v60  ;;  %563 = vmatpush.msra.mxu3 %v211_v61  ;;  %v254_v19 = vld [vmem:[%s1680_s1 + $0x6f8] sm:$0xff]  ;;  %v269_v20 = vld [vmem:[%s1680_s1 + $0x770] sm:$0xff]  ;;  %v236_v22 = vld [vmem:[%s1680_s1 + $0x668] sm:$0xff] }
  0x60   :  { %505 = vmatpush.msra.mxu0 %v161_v62  ;;  %524 = vmatpush.msra.mxu1 %v178_v63  ;;  %v286_v21 = vld [vmem:[%s1680_s1 + $0x7f8] sm:$0xff]  ;;  %v253_v23 = vld [vmem:[%s1680_s1 + $0x6f0] sm:$0xff]  ;;  %v268_v24 = vld [vmem:[%s1680_s1 + $0x768] sm:$0xff] }
  0x61   :  { %545 = vmatpush.msra.mxu2 %v193_v0  ;;  %564 = vmatpush.msra.mxu3 %v210_v1  ;;  %v285_v25 = vld [vmem:[%s1680_s1 + $0x7f0] sm:$0xff]  ;;  %v235_v26 = vld [vmem:[%s1680_s1 + $0x660] sm:$0xff]  ;;  %v252_v27 = vld [vmem:[%s1680_s1 + $0x6e8] sm:$0xff] }
  0x62   :  { %506 = vmatpush.msra.mxu0 %v160_v2  ;;  %525 = vmatpush.msra.mxu1 %v177_v3  ;;  %v267_v28 = vld [vmem:[%s1680_s1 + $0x760] sm:$0xff]  ;;  %v284_v29 = vld [vmem:[%s1680_s1 + $0x7e8] sm:$0xff]  ;;  %v234_v30 = vld [vmem:[%s1680_s1 + $0x658] sm:$0xff] }
  0x63   :  { %546 = vmatpush.msra.mxu2 %v192_v4  ;;  %565 = vmatpush.msra.mxu3 %v209_v5  ;;  %v251_v31 = vld [vmem:[%s1680_s1 + $0x6e0] sm:$0xff]  ;;  %v266_v32 = vld [vmem:[%s1680_s1 + $0x758] sm:$0xff]  ;;  %v233_v34 = vld [vmem:[%s1680_s1 + $0x650] sm:$0xff] }
  0x64   :  { %507 = vmatpush.msra.mxu0 %v159_v6  ;;  %526 = vmatpush.msra.mxu1 %v176_v7  ;;  %v283_v33 = vld [vmem:[%s1680_s1 + $0x7e0] sm:$0xff]  ;;  %v250_v35 = vld [vmem:[%s1680_s1 + $0x6d8] sm:$0xff]  ;;  %v265_v36 = vld [vmem:[%s1680_s1 + $0x750] sm:$0xff] }
  0x65   :  { %547 = vmatpush.msra.mxu2 %v191_v8  ;;  %566 = vmatpush.msra.mxu3 %v208_v9  ;;  %v282_v37 = vld [vmem:[%s1680_s1 + $0x7d8] sm:$0xff]  ;;  %v232_v38 = vld [vmem:[%s1680_s1 + $0x648] sm:$0xff]  ;;  %v249_v39 = vld [vmem:[%s1680_s1 + $0x6d0] sm:$0xff] }
  0x66   :  { %508 = vmatmul.f32.vlgmr.msra.gmra.mxu0 %v308_v10  ;;  %548 = vmatmul.f32.vlgmr.msra.gmra.mxu2 %v310_v11  ;;  %v264_v40 = vld [vmem:[%s1680_s1 + $0x748] sm:$0xff]  ;;  %v281_v41 = vld [vmem:[%s1680_s1 + $0x7d0] sm:$0xff]  ;;  %v231_v42 = vld [vmem:[%s1680_s1 + $0x640] sm:$0xff] }
  0x67   :  { %572 = vmatpush.msrb.mxu0 %v238_v12  ;;  %612 = vmatpush.msrb.mxu2 %v270_v13  ;;  %v248_v43 = vld [vmem:[%s1680_s1 + $0x6c8] sm:$0xff]  ;;  %v263_v44 = vld [vmem:[%s1680_s1 + $0x740] sm:$0xff]  ;;  %v230_v46 = vld [vmem:[%s1680_s1 + $0x638] sm:$0xff] }
  0x68   :  { %527 = vmatpush.msra.mxu1 %v175_v14  ;;  %567 = vmatpush.msra.mxu3 %v207_v15  ;;  %v280_v45 = vld [vmem:[%s1680_s1 + $0x7c8] sm:$0xff]  ;;  %v247_v47 = vld [vmem:[%s1680_s1 + $0x6c0] sm:$0xff]  ;;  %v262_v48 = vld [vmem:[%s1680_s1 + $0x738] sm:$0xff] }
  0x69   :  { %528 = vmatmul.f32.vlgmr.msra.gmra.mxu1 %v309_v16  ;;  %568 = vmatmul.f32.vlgmr.msra.gmra.mxu3 %v311_v17  ;;  %v279_v49 = vld [vmem:[%s1680_s1 + $0x7c0] sm:$0xff]  ;;  %v229_v50 = vld [vmem:[%s1680_s1 + $0x630] sm:$0xff]  ;;  %v246_v51 = vld [vmem:[%s1680_s1 + $0x6b8] sm:$0xff] }
  0x6a   :  { %573 = vmatpush.msrb.mxu0 %v237_v18  ;;  %592 = vmatpush.msrb.mxu1 %v254_v19  ;;  %v261_v52 = vld [vmem:[%s1680_s1 + $0x730] sm:$0xff]  ;;  %v278_v53 = vld [vmem:[%s1680_s1 + $0x7b8] sm:$0xff]  ;;  %v228_v54 = vld [vmem:[%s1680_s1 + $0x628] sm:$0xff] }
  0x6b   :  { %613 = vmatpush.msrb.mxu2 %v269_v20  ;;  %632 = vmatpush.msrb.mxu3 %v286_v21  ;;  %v245_v55 = vld [vmem:[%s1680_s1 + $0x6b0] sm:$0xff]  ;;  %v260_v56 = vld [vmem:[%s1680_s1 + $0x728] sm:$0xff]  ;;  %v227_v58 = vld [vmem:[%s1680_s1 + $0x620] sm:$0xff] }
  0x6c   :  { %574 = vmatpush.msrb.mxu0 %v236_v22  ;;  %593 = vmatpush.msrb.mxu1 %v253_v23  ;;  %v277_v57 = vld [vmem:[%s1680_s1 + $0x7b0] sm:$0xff]  ;;  %v244_v59 = vld [vmem:[%s1680_s1 + $0x6a8] sm:$0xff]  ;;  %v259_v60 = vld [vmem:[%s1680_s1 + $0x720] sm:$0xff] }
  0x6d   :  { %614 = vmatpush.msrb.mxu2 %v268_v24  ;;  %633 = vmatpush.msrb.mxu3 %v285_v25  ;;  %v276_v61 = vld [vmem:[%s1680_s1 + $0x7a8] sm:$0xff]  ;;  %v226_v62 = vld [vmem:[%s1680_s1 + $0x618] sm:$0xff]  ;;  %v243_v63 = vld [vmem:[%s1680_s1 + $0x6a0] sm:$0xff] }
  0x6e   :  { %575 = vmatpush.msrb.mxu0 %v235_v26  ;;  %594 = vmatpush.msrb.mxu1 %v252_v27  ;;  %v258_v0 = vld [vmem:[%s1680_s1 + $0x718] sm:$0xff]  ;;  %v275_v1 = vld [vmem:[%s1680_s1 + $0x7a0] sm:$0xff]  ;;  %v225_v2 = vld [vmem:[%s1680_s1 + $0x610] sm:$0xff] }
  0x6f   :  { %615 = vmatpush.msrb.mxu2 %v267_v28  ;;  %634 = vmatpush.msrb.mxu3 %v284_v29  ;;  %v242_v3 = vld [vmem:[%s1680_s1 + $0x698] sm:$0xff]  ;;  %v257_v4 = vld [vmem:[%s1680_s1 + $0x710] sm:$0xff]  ;;  %v224_v6 = vld [vmem:[%s1680_s1 + $0x608] sm:$0xff] }
  0x70   :  { %576 = vmatpush.msrb.mxu0 %v234_v30  ;;  %595 = vmatpush.msrb.mxu1 %v251_v31  ;;  %v274_v5 = vld [vmem:[%s1680_s1 + $0x798] sm:$0xff]  ;;  %v241_v7 = vld [vmem:[%s1680_s1 + $0x690] sm:$0xff]  ;;  %v256_v8 = vld [vmem:[%s1680_s1 + $0x708] sm:$0xff] }
  0x71   :  { %616 = vmatpush.msrb.mxu2 %v266_v32  ;;  %635 = vmatpush.msrb.mxu3 %v283_v33  ;;  %v273_v9 = vld [vmem:[%s1680_s1 + $0x790] sm:$0xff]  ;;  %v223_v10 = vld [vmem:[%s1680_s1 + $0x600] sm:$0xff]  ;;  %v240_v11 = vld [vmem:[%s1680_s1 + $0x688] sm:$0xff] }
  0x72   :  { %577 = vmatpush.msrb.mxu0 %v233_v34  ;;  %596 = vmatpush.msrb.mxu1 %v250_v35  ;;  %v255_v12 = vld [vmem:[%s1680_s1 + $0x700] sm:$0xff]  ;;  %v272_v13 = vld [vmem:[%s1680_s1 + $0x788] sm:$0xff]  ;;  %v314_v15 = vld.sshfl [vmem:[#allocation1 + $0x30] sm:$0xff pattern:$0x73625140] }
  0x73   :  { %617 = vmatpush.msrb.mxu2 %v265_v36  ;;  %636 = vmatpush.msrb.mxu3 %v282_v37  ;;  %v312_v14 = vld.sshfl [vmem:[#allocation1 + $0x20] sm:$0xff pattern:$0x73625140]  ;;  %v313_v18 = vld.sshfl [vmem:[#allocation1 + $0x28] sm:$0xff pattern:$0x73625140] }
  0x74   :  { %578 = vmatpush.msrb.mxu0 %v232_v38  ;;  %597 = vmatpush.msrb.mxu1 %v249_v39  ;;  %v239_v16 = vld [vmem:[%s1680_s1 + $0x680] sm:$0xff]  ;;  %v315_v19 = vld.sshfl [vmem:[#allocation1 + $0x38] sm:$0xff pattern:$0x73625140]  ;;  %v659_v28 = vld [vmem:[%s1682_s3 + $0x30] sm:$0xff] }
  0x75   :  { %618 = vmatpush.msrb.mxu2 %v264_v40  ;;  %637 = vmatpush.msrb.mxu3 %v281_v41  ;;  %v271_v17 = vld [vmem:[%s1680_s1 + $0x780] sm:$0xff]  ;;  %v660_v20 = vld [vmem:[%s1682_s3 + $0x38] sm:$0xff]  ;;  %v658_v30 = vld [vmem:[%s1682_s3 + $0x28] sm:$0xff]  ;;  %s744_s1 = sshll.u32 %s1686_s7, 4  ;;  %s745_s1 = int_to_ptr.hbm [resolvable:$true] %s744_s1 }
  0x76   :  { %579 = vmatpush.msrb.mxu0 %v231_v42  ;;  %598 = vmatpush.msrb.mxu1 %v248_v43  ;;  %v756_v21 = vld [vmem:[%s1681_s2] ss:$0 sm:$0xff]  ;;  %v656_v34 = vld [vmem:[%s1682_s3 + $0x18] sm:$0xff]  ;;  %v655_v36 = vld [vmem:[%s1682_s3 + $0x10] sm:$0xff] }
  0x77   :  { %619 = vmatpush.msrb.mxu2 %v263_v44  ;;  %638 = vmatpush.msrb.mxu3 %v280_v45  ;;  %v657_v32 = vld [vmem:[%s1682_s3 + $0x20] sm:$0xff]  ;;  %v654_v38 = vld [vmem:[%s1682_s3 + $0x8] sm:$0xff]  ;;  %v693_v42 = vld [vmem:[%s1684_s5 + $0x18] sm:$0xff] }
  0x78   :  { %580 = vmatpush.msrb.mxu0 %v230_v46  ;;  %599 = vmatpush.msrb.mxu1 %v247_v47  ;;  %v653_v40 = vld [vmem:[%s1682_s3] sm:$0xff]  ;;  %v692_v43 = vld [vmem:[%s1684_s5 + $0x10] sm:$0xff] }
  0x79   :  { %620 = vmatpush.msrb.mxu2 %v262_v48  ;;  %639 = vmatpush.msrb.mxu3 %v279_v49 }
  0x7a   :  { %581 = vmatpush.msrb.mxu0 %v229_v50  ;;  %600 = vmatpush.msrb.mxu1 %v246_v51 }
  0x7b   :  { %621 = vmatpush.msrb.mxu2 %v261_v52  ;;  %640 = vmatpush.msrb.mxu3 %v278_v53 }
  0x7c   :  { %582 = vmatpush.msrb.mxu0 %v228_v54  ;;  %601 = vmatpush.msrb.mxu1 %v245_v55 }
  0x7d   :  { %622 = vmatpush.msrb.mxu2 %v260_v56  ;;  %641 = vmatpush.msrb.mxu3 %v277_v57 }
  0x7e   :  { %583 = vmatpush.msrb.mxu0 %v227_v58  ;;  %602 = vmatpush.msrb.mxu1 %v244_v59 }
  0x7f   :  { %623 = vmatpush.msrb.mxu2 %v259_v60  ;;  %642 = vmatpush.msrb.mxu3 %v276_v61 }
  0x80   :  { %584 = vmatpush.msrb.mxu0 %v226_v62  ;;  %603 = vmatpush.msrb.mxu1 %v243_v63 }
  0x81   :  { %624 = vmatpush.msrb.mxu2 %v258_v0  ;;  %643 = vmatpush.msrb.mxu3 %v275_v1  ;;  %v691_v0 = vld [vmem:[%s1684_s5 + $0x8] sm:$0xff]  ;;  %v690_v1 = vld [vmem:[%s1684_s5] sm:$0xff] }
  0x82   :  { %585 = vmatpush.msrb.mxu0 %v225_v2  ;;  %604 = vmatpush.msrb.mxu1 %v242_v3  ;;  %v757_v2 = vld [vmem:[%s1683_s4] ss:$0 sm:$0xff]  ;;  %s789_s4 = smov [#allocation2]  }
  0x83   :  { %625 = vmatpush.msrb.mxu2 %v257_v4  ;;  %644 = vmatpush.msrb.mxu3 %v274_v5  ;;  %s742_s5 = sshll.u32 %s789_s4, 4  ;;  %s743_s5 = int_to_ptr.vmem [resolvable:$true] %s742_s5 }
  0x84   :  { %586 = vmatpush.msrb.mxu0 %v224_v6  ;;  %605 = vmatpush.msrb.mxu1 %v241_v7  ;;  %v758_v6 = vld [vmem:[%s1685_s6] ss:$0 sm:$0xff] }
  0x85   :  { %626 = vmatpush.msrb.mxu2 %v256_v8  ;;  %645 = vmatpush.msrb.mxu3 %v273_v9 }
  0x86   :  { %587 = vmatpush.msrb.mxu0 %v223_v10  ;;  %606 = vmatpush.msrb.mxu1 %v240_v11 }
  0x87   :  { %627 = vmatpush.msrb.mxu2 %v255_v12  ;;  %646 = vmatpush.msrb.mxu3 %v272_v13 }
  0x88   :  { %588 = vmatmul.f32.vlgmr.msrb.gmra.mxu0 %v312_v14  ;;  %628 = vmatmul.f32.vlgmr.msrb.gmra.mxu2 %v314_v15 }
  0x89   :  { %607 = vmatpush.msrb.mxu1 %v239_v16  ;;  %647 = vmatpush.msrb.mxu3 %v271_v17 }
  0x8a   :  { %608 = vmatmul.f32.vlgmr.msrb.gmra.mxu1 %v313_v18  ;;  %648 = vmatmul.f32.vlgmr.msrb.gmra.mxu3 %v315_v19 }
  0x8b   :  { %677 = vmatpush.msra.mxu0 %v660_v20  ;;  %714 = vmatpush.msra.mxu1 %v693_v42 }
  0x8d   :  { %678 = vmatpush.msra.mxu0 %v659_v28  ;;  %715 = vmatpush.msra.mxu1 %v692_v43 }
  0x8f   :  { %679 = vmatpush.msra.mxu0 %v658_v30  ;;  %716 = vmatpush.msra.mxu1 %v691_v0 }
  0x91   :  { %680 = vmatpush.msra.mxu0 %v657_v32  ;;  %717 = vmatpush.msra.mxu1 %v690_v1 }
  0x93   :  { %681 = vmatpush.msra.mxu0 %v656_v34 }
  0x95   :  { %682 = vmatpush.msra.mxu0 %v655_v36 }
  0x97   :  { %683 = vmatpush.msra.mxu0 %v654_v38 }
  0x99   :  { %684 = vmatpush.msra.mxu0 %v653_v40 }
  0xbf   :  { %v349_v22 = vpop.f32.mrf.mxu0 }
  0xc0   :  { %v350_v23 = vadd.f32 %v756_v21, %v349_v22 }
  0xc2   :  { %v369_v24 = vpop.f32.mrf.mxu1 }
  0xc3   :  { %v370_v25 = vadd.f32 %v369_v24, %v350_v23 }
  0xc5   :  { %v389_v26 = vpop.f32.mrf.mxu2 }
  0xc6   :  { %v390_v27 = vadd.f32 %v389_v26, %v370_v25 }
  0xc8   :  { %v409_v29 = vpop.f32.mrf.mxu3 }
  0xc9   :  { %v410_v31 = vadd.f32 %v409_v29, %v390_v27 }
  0xcb   :  { %v429_v33 = vpop.f32.mrf.mxu0 }
  0xcc   :  { %v430_v35 = vadd.f32 %v429_v33, %v410_v31 }
  0xce   :  { %v449_v37 = vpop.f32.mrf.mxu1 }
  0xcf   :  { %v450_v39 = vadd.f32 %v449_v37, %v430_v35  ;;  %v469_v41 = vpop.f32.mrf.mxu2 }
  0xd1   :  { %v470_v44 = vadd.f32 %v469_v41, %v450_v39 }
  0xd2   :  { %v489_v45 = vpop.f32.mrf.mxu3 }
  0xd3   :  { %v490_v47 = vadd.f32 %v489_v45, %v470_v44 }
  0xe3   :  { %v509_v46 = vpop.f32.mrf.mxu0 }
  0xe4   :  { %v510_v48 = vadd.f32 %v509_v46, %v490_v47 }
  0xe6   :  { %v529_v49 = vpop.f32.mrf.mxu1 }
  0xe7   :  { %v530_v51 = vadd.f32 %v529_v49, %v510_v48 }
  0xe9   :  { %v549_v50 = vpop.f32.mrf.mxu2 }
  0xea   :  { %v550_v52 = vadd.f32 %v549_v50, %v530_v51 }
  0xec   :  { %v569_v53 = vpop.f32.mrf.mxu3 }
  0xed   :  { %v570_v54 = vadd.f32 %v569_v53, %v550_v52 }
 0x105   :  { %v589_v55 = vpop.f32.mrf.mxu0 }
 0x106   :  { %v590_v56 = vadd.f32 %v589_v55, %v570_v54 }
 0x107   :  { %v609_v57 = vpop.f32.mrf.mxu1 }
 0x108   :  { %v610_v58 = vadd.f32 %v609_v57, %v590_v56 }
 0x10b   :  { %v629_v59 = vpop.f32.mrf.mxu2 }
 0x10c   :  { %v630_v60 = vadd.f32 %v629_v59, %v610_v58 }
 0x10d   :  { %v649_v61 = vpop.f32.mrf.mxu3 }
 0x10e   :  { %v650_v62 = vadd.f32 %v649_v61, %v630_v60 }
 0x110   :  { %v652_v63 = vmax.f32 %v650_v62, 0.0 }
 0x112   :  { %753 = vmatmul.msk.f32.vlgmr.msra.gmra.mxu0 %vm665_vm0, %v652_v63 }
 0x18f   :  { %v686_v3 = vpop.f32.mrf.mxu0 }
 0x190   :  { %v687_v4 = vadd.f32 %v757_v2, %v686_v3 }
 0x192   :  { %v689_v5 = vmax.f32 %v687_v4, 0.0 }
 0x194   :  { %754 = vmatmul.msk.f32.vlgmr.msra.gmra.mxu1 %vm698_vm1, %v689_v5 }
 0x211   :  { %v719_v7 = vpop.f32.mrf.mxu1 }
 0x212   :  { %v720_v8 = vadd.f32 %v758_v6, %v719_v7 }
 0x214   :  { %v723_v9 = vsel %vm722_vm2, %v720_v8, -inf }
 0x215   :  { %724 = vmax.xlane.f32.xlu0 %v723_v9 }
 0x288   :  { %v725_v10 = vpop.xlane.xlu0 %724 }
 0x289   :  { %v726_v11 = vsub.f32 %v720_v8, %v725_v10 }
 0x28b   :  { %v727_v12 = vmul.f32 1.442695, %v726_v11 }
 0x28d   :  { %759 = vpow2.f32 %v727_v12 }
 0x293   :  { %v760_v13 = vpop.eup %759 }
 0x294   :  { %v729_v14 = vsel %vm722_vm2, %v760_v13, 0.0 }
 0x295   :  { %730 = vadd.xlane.f32.xlu0 %v729_v14 }
 0x308   :  { %v731_v15 = vpop.xlane.xlu0 %730 }
 0x309   :  { %761 = vlog2.f32 %v731_v15 }
 0x30f   :  { %v762_v16 = vpop.eup %761 }
 0x310   :  { %v733_v17 = vmul.f32 0.6931472, %v762_v16 }
 0x312   :  { %v734_v18 = vadd.f32 %v733_v17, %v725_v10 }
 0x314   :  { %v735_v19 = vsub.f32 %v720_v8, %v734_v18 }
 0x316   :  { %736 = vst.msk [vmem:[#allocation2] sm:$0x3] %vm722_vm2, %v735_v19 }
 0x317   :  { %747 = dma.vmem_to_hbm [thread:$0]  %s743_s5, 32, %s745_s1, [#allocation3]  }
 0x318   :  { %787 = dma.done.wait [#allocation3], 32  }
 0x319   :  { %788 = vsyncadd [#allocation3], 4294967264 }
 0x31a   :  { %752 = vsyncpa [#allocation3], 1 }

</bundles_post_ra>
